<compile_context>
chip_gen: v7x
topology: tpu7x:2x2x1
jax: 0.10.0
libtpu: 0.0.40
codegen_flags: <defaults>
</compile_context>

<pallas_src>
import functools

import jax
import jax.numpy as jnp
import numpy as np
from jax.experimental import pallas as pl
from jax.experimental.pallas import tpu as pltpu


# ---------------------------------------------------------------------------
# Row-tiled matmul + bias kernel: per-layer input projection
#   (T*B, D) @ (D, 4H) + b  ->  pre-gates for the whole sequence.
# ---------------------------------------------------------------------------
def _matmul_bias_kernel(x_ref, w_ref, b_ref, o_ref):
    o_ref[...] = (
        jnp.dot(x_ref[...], w_ref[...], preferred_element_type=jnp.float32)
        + b_ref[...]
    ).astype(o_ref.dtype)


def matmul_bias(x2d, w, b, row_tile=512):
    """x2d: (N, K), w: (K, M), b: (1, M) -> (N, M) float32."""
    N, K = x2d.shape
    M = w.shape[1]
    tm = N if N <= row_tile else row_tile        # full-dim block or 512-row tile
    return pl.pallas_call(
        _matmul_bias_kernel,
        out_shape=jax.ShapeDtypeStruct((N, M), jnp.float32),
        grid_spec=pltpu.PrefetchScalarGridSpec(
            num_scalar_prefetch=0,
            grid=(pl.cdiv(N, tm),),
            in_specs=[
                pl.BlockSpec((tm, K), lambda i: (i, 0)),
                pl.BlockSpec((K, M), lambda i: (0, 0)),
                pl.BlockSpec((1, M), lambda i: (0, 0)),
            ],
            out_specs=pl.BlockSpec((tm, M), lambda i: (i, 0)),
        ),
        compiler_params=pltpu.CompilerParams(
            dimension_semantics=("parallel",)),
    )(x2d, w, b)


# ---------------------------------------------------------------------------
# Recurrence kernels.  pg_ref holds precomputed pre-gates (x@W_ih + bias) for
# a chunk of Tc timesteps; only h @ W_hh is computed on the serial path.
# ---------------------------------------------------------------------------
def _lstm_gate_step(pregates, h, c, w_hh):
    """One LSTM cell update given pre-gates (B, 4H), state (B, H)."""
    H = h.shape[1]
    gates = pregates + jnp.dot(h, w_hh, preferred_element_type=jnp.float32)
    i_g = jax.nn.sigmoid(gates[:, 0 * H:1 * H])
    f_g = jax.nn.sigmoid(gates[:, 1 * H:2 * H])
    g_g = jnp.tanh(gates[:, 2 * H:3 * H])
    o_g = jax.nn.sigmoid(gates[:, 3 * H:4 * H])
    c_new = f_g * c + i_g * g_g
    h_new = o_g * jnp.tanh(c_new)
    return h_new, c_new


def _lstm_recurrent_kernel(pg_ref, whh_ref, out_ref, h_sc, c_sc):
    """Intermediate layer: writes the hidden sequence chunk (Tc, B, H)."""
    @pl.when(pl.program_id(0) == 0)
    def _():
        h_sc[...] = jnp.zeros_like(h_sc)
        c_sc[...] = jnp.zeros_like(c_sc)

    w_hh = whh_ref[...]
    Tc = pg_ref.shape[0]

    def step(t, carry):
        h_new, c_new = _lstm_gate_step(pg_ref[t], h_sc[...], c_sc[...], w_hh)
        h_sc[...] = h_new
        c_sc[...] = c_new
        out_ref[t] = h_new.astype(out_ref.dtype)
        return carry

    jax.lax.fori_loop(0, Tc, step, 0, unroll=True)


def _lstm_recurrent_fc_kernel(pg_ref, whh_ref, fcw_ref, fcb_ref, y_ref,
                              h_sc, c_sc, hout_sc):
    """Last layer: recurrence + fused Linear head; writes (Tc, B, O)."""
    @pl.when(pl.program_id(0) == 0)
    def _():
        h_sc[...] = jnp.zeros_like(h_sc)
        c_sc[...] = jnp.zeros_like(c_sc)

    w_hh = whh_ref[...]
    Tc = pg_ref.shape[0]

    def step(t, carry):
        h_new, c_new = _lstm_gate_step(pg_ref[t], h_sc[...], c_sc[...], w_hh)
        h_sc[...] = h_new
        c_sc[...] = c_new
        hout_sc[t] = h_new
        return carry

    jax.lax.fori_loop(0, Tc, step, 0, unroll=True)

    # Fused FC head over the whole chunk: one (Tc*B, H) @ (H, O) matmul.
    B, H = h_sc.shape
    hc = hout_sc[...].reshape(Tc * B, H)
    y = jnp.dot(hc, fcw_ref[...], preferred_element_type=jnp.float32) + fcb_ref[...]
    y_ref[...] = y.reshape(Tc, B, -1).astype(y_ref.dtype)


def _pick_time_chunk(T, max_chunk=16):
    tc = min(T, max_chunk)
    while T % tc != 0:
        tc -= 1
    return tc


def lstm_recurrence(pregates_tbg, w_hh):
    """pregates: (T, B, 4H), w_hh: (H, 4H) -> hidden sequence (T, B, H)."""
    T, B, G = pregates_tbg.shape
    H = w_hh.shape[0]
    Tc = _pick_time_chunk(T)
    return pl.pallas_call(
        _lstm_recurrent_kernel,
        out_shape=jax.ShapeDtypeStruct((T, B, H), jnp.float32),
        grid_spec=pltpu.PrefetchScalarGridSpec(
            num_scalar_prefetch=0,
            grid=(T // Tc,),
            in_specs=[
                pl.BlockSpec((Tc, B, G), lambda i: (i, 0, 0)),
                pl.BlockSpec((H, G), lambda i: (0, 0)),
            ],
            out_specs=pl.BlockSpec((Tc, B, H), lambda i: (i, 0, 0)),
            scratch_shapes=[
                pltpu.VMEM((B, H), jnp.float32),   # h state
                pltpu.VMEM((B, H), jnp.float32),   # c state
            ],
        ),
        compiler_params=pltpu.CompilerParams(
            dimension_semantics=("arbitrary",)),
    )(pregates_tbg, w_hh)


def lstm_recurrence_fc(pregates_tbg, w_hh, fc_w, fc_b):
    """Last layer recurrence with fused Linear head -> (T, B, O)."""
    T, B, G = pregates_tbg.shape
    H = w_hh.shape[0]
    O = fc_w.shape[1]
    Tc = _pick_time_chunk(T)
    return pl.pallas_call(
        _lstm_recurrent_fc_kernel,
        out_shape=jax.ShapeDtypeStruct((T, B, O), jnp.float32),
        grid_spec=pltpu.PrefetchScalarGridSpec(
            num_scalar_prefetch=0,
            grid=(T // Tc,),
            in_specs=[
                pl.BlockSpec((Tc, B, G), lambda i: (i, 0, 0)),
                pl.BlockSpec((H, G), lambda i: (0, 0)),
                pl.BlockSpec((H, O), lambda i: (0, 0)),
                pl.BlockSpec((1, O), lambda i: (0, 0)),
            ],
            out_specs=pl.BlockSpec((Tc, B, O), lambda i: (i, 0, 0)),
            scratch_shapes=[
                pltpu.VMEM((B, H), jnp.float32),       # h state
                pltpu.VMEM((B, H), jnp.float32),       # c state
                pltpu.VMEM((Tc, B, H), jnp.float32),   # hidden chunk buffer
            ],
        ),
        compiler_params=pltpu.CompilerParams(
            dimension_semantics=("arbitrary",)),
    )(pregates_tbg, w_hh, fc_w, fc_b)


# ---------------------------------------------------------------------------
# Full model: multi-layer LSTM (batch_first) + Linear head.
# ---------------------------------------------------------------------------
@functools.partial(jax.jit)
def tlstm_forward(x_btd, params):
    # One small time-major transpose of the (narrow) input; everything else
    # stays time-major so per-timestep blocks are contiguous (1 HBM pass).
    x_tbd = jnp.transpose(x_btd, (1, 0, 2)).astype(jnp.float32)   # (T, B, D)
    T, B, _ = x_tbd.shape

    h = x_tbd
    n_layers = len(params["lstm"])
    y = None
    for li, (w_ih, w_hh, bias) in enumerate(params["lstm"]):
        D = h.shape[-1]
        H = w_hh.shape[0]
        # One big MXU matmul for the whole sequence (bias folded in here).
        pregates = matmul_bias(h.reshape(T * B, D), w_ih, bias)   # (T*B, 4H)
        pregates = pregates.reshape(T, B, 4 * H)
        if li == n_layers - 1:
            y = lstm_recurrence_fc(pregates, w_hh,
                                   params["fc_w"], params["fc_b"])  # (T, B, O)
        else:
            h = lstm_recurrence(pregates, w_hh)                     # (T, B, H)
    return jnp.transpose(y, (1, 0, 2))                              # (B, T, O)


def init_params(key, input_dim, hidden_dim, layer_dim, output_dim):
    """Deterministic init mirroring PyTorch's uniform(-1/sqrt(H), 1/sqrt(H))."""
    params = {"lstm": []}
    bound = 1.0 / np.sqrt(hidden_dim)
    d_in = input_dim
    for _ in range(layer_dim):
        key, k1, k2, k3, k4 = jax.random.split(key, 5)
        # stored as (D, 4H) / (H, 4H) so kernels do x @ W (gate order i,f,g,o)
        w_ih = jax.random.uniform(k1, (d_in, 4 * hidden_dim), jnp.float32,
                                  -bound, bound)
        w_hh = jax.random.uniform(k2, (hidden_dim, 4 * hidden_dim), jnp.float32,
                                  -bound, bound)
        b_ih = jax.random.uniform(k3, (4 * hidden_dim,), jnp.float32, -bound, bound)
        b_hh = jax.random.uniform(k4, (4 * hidden_dim,), jnp.float32, -bound, bound)
        params["lstm"].append((w_ih, w_hh, (b_ih + b_hh).reshape(1, -1)))
        d_in = hidden_dim
    key, k5, k6 = jax.random.split(key, 3)
    fb = 1.0 / np.sqrt(hidden_dim)
    params["fc_w"] = jax.random.uniform(k5, (hidden_dim, output_dim), jnp.float32,
                                        -fb, fb)
    params["fc_b"] = jax.random.uniform(k6, (1, output_dim), jnp.float32, -fb, fb)
    return params


def reference_forward(x_btd, params):
    """Pure-JAX reference (same math) used for a silent correctness check."""
    h_seq = jnp.transpose(x_btd, (1, 0, 2)).astype(jnp.float32)  # (T, B, D)
    for (w_ih, w_hh, bias) in params["lstm"]:
        T, B, _ = h_seq.shape
        H = w_hh.shape[0]
        h = jnp.zeros((B, H), jnp.float32)
        c = jnp.zeros((B, H), jnp.float32)
        outs = []
        for t in range(T):
            g = h_seq[t] @ w_ih + h @ w_hh + bias
            i_g = jax.nn.sigmoid(g[:, :H])
            f_g = jax.nn.sigmoid(g[:, H:2 * H])
            g_g = jnp.tanh(g[:, 2 * H:3 * H])
            o_g = jax.nn.sigmoid(g[:, 3 * H:])
            c = f_g * c + i_g * g_g
            h = o_g * jnp.tanh(c)
            outs.append(h)
        h_seq = jnp.stack(outs, axis=0)
    y = h_seq @ params["fc_w"] + params["fc_b"]
    return jnp.transpose(y, (1, 0, 2))


if __name__ == "__main__":
    B, T = 2, 8
    input_dim, hidden_dim, layer_dim, output_dim = 16, 32, 2, 8

    key = jax.random.PRNGKey(0)
    key, xk = jax.random.split(key)
    x = jax.random.normal(xk, (B, T, input_dim), dtype=jnp.float32)

    params = init_params(key, input_dim, hidden_dim, layer_dim, output_dim)

    out = tlstm_forward(x, params)
    out = jax.block_until_ready(out)

    ref = reference_forward(x, params)
    np.testing.assert_allclose(np.asarray(out), np.asarray(ref),
                               rtol=1e-4, atol=1e-4)
    assert out.shape == (B, T, output_dim)
    print("KERNEL_OK")
</pallas_src>

<mosaic_0001>
module attributes {stable_mosaic.version = 11 : i64} {
  func.func @_matmul_bias_kernel(%arg0: i32, %arg1: memref<16x16xf32, #tpu.memory_space<vmem>>, %arg2: memref<16x128xf32, #tpu.memory_space<vmem>>, %arg3: memref<1x128xf32, #tpu.memory_space<vmem>>, %arg4: memref<16x128xf32, #tpu.memory_space<vmem>>) attributes {dimension_semantics = [#tpu.dimension_semantics<parallel>], iteration_bounds = array<i64: 1>, scalar_prefetch = 0 : i64, scratch_operands = 0 : i64, tpu.core_type = #tpu.core_type<tc>, window_params = [{transform_indices = @transform_0, window_bounds = array<i64: 16, 16>}, {pipeline_mode = #tpu.pipeline_mode<synchronous>, transform_indices = @transform_1, window_bounds = array<i64: 16, 128>}, {pipeline_mode = #tpu.pipeline_mode<synchronous>, transform_indices = @transform_2, window_bounds = array<i64: 1, 128>}, {transform_indices = @transform_3, window_bounds = array<i64: 16, 128>}]} {
    %c0 = arith.constant 0 : index
    %c0_0 = arith.constant 0 : index
    %0 = vector.load %arg1[%c0, %c0_0] : memref<16x16xf32, #tpu.memory_space<vmem>>, vector<16x16xf32>
    %c0_1 = arith.constant 0 : index
    %c0_2 = arith.constant 0 : index
    %1 = vector.load %arg2[%c0_1, %c0_2] : memref<16x128xf32, #tpu.memory_space<vmem>>, vector<16x128xf32>
    %cst = arith.constant dense<0.000000e+00> : vector<16x128xf32>
    %2 = tpu.matmul %0, %1, %cst {dimension_numbers = #tpu.dot_dimension_numbers<[1], [0], [0], [1], [0, 0, 1, 1], [], []>} : vector<16x16xf32>, vector<16x128xf32>, vector<16x128xf32> -> vector<16x128xf32>
    %c0_3 = arith.constant 0 : index
    %c0_4 = arith.constant 0 : index
    %3 = vector.load %arg3[%c0_3, %c0_4] : memref<1x128xf32, #tpu.memory_space<vmem>>, vector<1x128xf32>
    %4 = vector.broadcast %3 : vector<1x128xf32> to vector<16x128xf32>
    %5 = arith.addf %2, %4 : vector<16x128xf32>
    %c0_5 = arith.constant 0 : index
    %c0_6 = arith.constant 0 : index
    %6 = vector.load %arg4[%c0_5, %c0_6] : memref<16x128xf32, #tpu.memory_space<vmem>>, vector<16x128xf32>
    tpu.vector_store %arg4[%c0_5, %c0_6], %5 {strides = array<i32>} : memref<16x128xf32, #tpu.memory_space<vmem>>, vector<16x128xf32>,
    return
  }
  func.func @transform_0(%arg0: i32) -> (i32, i32) {
    %c0_i32 = arith.constant 0 : i32
    %c0_i32_0 = arith.constant 0 : i32
    return %arg0, %c0_i32 : i32, i32
  }
  func.func @transform_1(%arg0: i32) -> (i32, i32) {
    %c0_i32 = arith.constant 0 : i32
    %c0_i32_0 = arith.constant 0 : i32
    %c0_i32_1 = arith.constant 0 : i32
    return %c0_i32, %c0_i32_0 : i32, i32
  }
  func.func @transform_2(%arg0: i32) -> (i32, i32) {
    %c0_i32 = arith.constant 0 : i32
    %c0_i32_0 = arith.constant 0 : i32
    %c0_i32_1 = arith.constant 0 : i32
    return %c0_i32, %c0_i32_0 : i32, i32
  }
  func.func @transform_3(%arg0: i32) -> (i32, i32) {
    %c0_i32 = arith.constant 0 : i32
    %c0_i32_0 = arith.constant 0 : i32
    return %arg0, %c0_i32 : i32, i32
  }
}

module attributes {stable_mosaic.version = 11 : i64} {
  func.func @_matmul_bias_kernel(%arg0: i32, %arg1: memref<16x32xf32, #tpu.memory_space<vmem>>, %arg2: memref<32x128xf32, #tpu.memory_space<vmem>>, %arg3: memref<1x128xf32, #tpu.memory_space<vmem>>, %arg4: memref<16x128xf32, #tpu.memory_space<vmem>>) attributes {dimension_semantics = [#tpu.dimension_semantics<parallel>], iteration_bounds = array<i64: 1>, scalar_prefetch = 0 : i64, scratch_operands = 0 : i64, tpu.core_type = #tpu.core_type<tc>, window_params = [{transform_indices = @transform_0, window_bounds = array<i64: 16, 32>}, {pipeline_mode = #tpu.pipeline_mode<synchronous>, transform_indices = @transform_1, window_bounds = array<i64: 32, 128>}, {pipeline_mode = #tpu.pipeline_mode<synchronous>, transform_indices = @transform_2, window_bounds = array<i64: 1, 128>}, {transform_indices = @transform_3, window_bounds = array<i64: 16, 128>}]} {
    %c0 = arith.constant 0 : index
    %c0_0 = arith.constant 0 : index
    %0 = vector.load %arg1[%c0, %c0_0] : memref<16x32xf32, #tpu.memory_space<vmem>>, vector<16x32xf32>
    %c0_1 = arith.constant 0 : index
    %c0_2 = arith.constant 0 : index
    %1 = vector.load %arg2[%c0_1, %c0_2] : memref<32x128xf32, #tpu.memory_space<vmem>>, vector<32x128xf32>
    %cst = arith.constant dense<0.000000e+00> : vector<16x128xf32>
    %2 = tpu.matmul %0, %1, %cst {dimension_numbers = #tpu.dot_dimension_numbers<[1], [0], [0], [1], [0, 0, 1, 1], [], []>} : vector<16x32xf32>, vector<32x128xf32>, vector<16x128xf32> -> vector<16x128xf32>
    %c0_3 = arith.constant 0 : index
    %c0_4 = arith.constant 0 : index
    %3 = vector.load %arg3[%c0_3, %c0_4] : memref<1x128xf32, #tpu.memory_space<vmem>>, vector<1x128xf32>
    %4 = vector.broadcast %3 : vector<1x128xf32> to vector<16x128xf32>
    %5 = arith.addf %2, %4 : vector<16x128xf32>
    %c0_5 = arith.constant 0 : index
    %c0_6 = arith.constant 0 : index
    %6 = vector.load %arg4[%c0_5, %c0_6] : memref<16x128xf32, #tpu.memory_space<vmem>>, vector<16x128xf32>
    tpu.vector_store %arg4[%c0_5, %c0_6], %5 {strides = array<i32>} : memref<16x128xf32, #tpu.memory_space<vmem>>, vector<16x128xf32>,
    return
  }
  func.func @transform_0(%arg0: i32) -> (i32, i32) {
    %c0_i32 = arith.constant 0 : i32
    %c0_i32_0 = arith.constant 0 : i32
    return %arg0, %c0_i32 : i32, i32
  }
  func.func @transform_1(%arg0: i32) -> (i32, i32) {
    %c0_i32 = arith.constant 0 : i32
    %c0_i32_0 = arith.constant 0 : i32
    %c0_i32_1 = arith.constant 0 : i32
    return %c0_i32, %c0_i32_0 : i32, i32
  }
  func.func @transform_2(%arg0: i32) -> (i32, i32) {
    %c0_i32 = arith.constant 0 : i32
    %c0_i32_0 = arith.constant 0 : i32
    %c0_i32_1 = arith.constant 0 : i32
    return %c0_i32, %c0_i32_0 : i32, i32
  }
  func.func @transform_3(%arg0: i32) -> (i32, i32) {
    %c0_i32 = arith.constant 0 : i32
    %c0_i32_0 = arith.constant 0 : i32
    return %arg0, %c0_i32 : i32, i32
  }
}

module attributes {stable_mosaic.version = 11 : i64} {
  func.func @_lstm_recurrent_kernel(%arg0: i32, %arg1: memref<8x2x128xf32, #tpu.memory_space<vmem>>, %arg2: memref<32x128xf32, #tpu.memory_space<vmem>>, %arg3: memref<8x2x32xf32, #tpu.memory_space<vmem>>, %arg4: memref<2x32xf32, #tpu.memory_space<vmem>>, %arg5: memref<2x32xf32, #tpu.memory_space<vmem>>) attributes {dimension_semantics = [#tpu.dimension_semantics<arbitrary>], iteration_bounds = array<i64: 1>, scalar_prefetch = 0 : i64, scratch_operands = 2 : i64, tpu.core_type = #tpu.core_type<tc>, window_params = [{transform_indices = @transform_0, window_bounds = array<i64: 8, 2, 128>}, {pipeline_mode = #tpu.pipeline_mode<synchronous>, transform_indices = @transform_1, window_bounds = array<i64: 32, 128>}, {transform_indices = @transform_2, window_bounds = array<i64: 8, 2, 32>}]} {
    %c0_i32 = arith.constant 0 : i32
    %0 = arith.cmpi eq, %arg0, %c0_i32 : i32
    %1 = arith.extui %0 : i1 to i32
    %c0_i32_0 = arith.constant 0 : i32
    %2 = arith.cmpi ne, %1, %c0_i32_0 : i32
    scf.if %2 {
      %cst_130 = arith.constant 0.000000e+00 : f32
      %308 = vector.broadcast %cst_130 : f32 to vector<2x32xf32>
      %c0_131 = arith.constant 0 : index
      %c0_132 = arith.constant 0 : index
      %309 = vector.load %arg4[%c0_131, %c0_132] : memref<2x32xf32, #tpu.memory_space<vmem>>, vector<2x32xf32>
      tpu.vector_store %arg4[%c0_131, %c0_132], %308 {strides = array<i32>} : memref<2x32xf32, #tpu.memory_space<vmem>>, vector<2x32xf32>,
      %cst_133 = arith.constant 0.000000e+00 : f32
      %310 = vector.broadcast %cst_133 : f32 to vector<2x32xf32>
      %c0_134 = arith.constant 0 : index
      %c0_135 = arith.constant 0 : index
      %311 = vector.load %arg5[%c0_134, %c0_135] : memref<2x32xf32, #tpu.memory_space<vmem>>, vector<2x32xf32>
      tpu.vector_store %arg5[%c0_134, %c0_135], %310 {strides = array<i32>} : memref<2x32xf32, #tpu.memory_space<vmem>>, vector<2x32xf32>,
    } else {
    }
    %c0 = arith.constant 0 : index
    %c0_1 = arith.constant 0 : index
    %3 = vector.load %arg2[%c0, %c0_1] : memref<32x128xf32, #tpu.memory_space<vmem>>, vector<32x128xf32>
    %c0_i32_2 = arith.constant 0 : i32
    %4 = arith.index_cast %c0_i32_2 : i32 to index
    %c0_3 = arith.constant 0 : index
    %c0_4 = arith.constant 0 : index
    %5 = vector.load %arg1[%4, %c0_3, %c0_4] : memref<8x2x128xf32, #tpu.memory_space<vmem>>, vector<1x2x128xf32>
    %6 = vector.shape_cast %5 : vector<1x2x128xf32> to vector<2x128xf32>
    %c0_5 = arith.constant 0 : index
    %c0_6 = arith.constant 0 : index
    %7 = vector.load %arg4[%c0_5, %c0_6] : memref<2x32xf32, #tpu.memory_space<vmem>>, vector<2x32xf32>
    %c0_7 = arith.constant 0 : index
    %c0_8 = arith.constant 0 : index
    %8 = vector.load %arg5[%c0_7, %c0_8] : memref<2x32xf32, #tpu.memory_space<vmem>>, vector<2x32xf32>
    %cst = arith.constant dense<0.000000e+00> : vector<2x128xf32>
    %9 = tpu.matmul %7, %3, %cst {dimension_numbers = #tpu.dot_dimension_numbers<[1], [0], [0], [1], [0, 0, 1, 1], [], []>} : vector<2x32xf32>, vector<32x128xf32>, vector<2x128xf32> -> vector<2x128xf32>
    %10 = arith.addf %6, %9 : vector<2x128xf32>
    %11 = vector.extract_strided_slice %10 {offsets = [0, 0], sizes = [2, 32], strides = [1, 1]} : vector<2x128xf32> to vector<2x32xf32>
    %12 = arith.negf %11 : vector<2x32xf32>
    %13 = math.exp %12 : vector<2x32xf32>
    %cst_9 = arith.constant 1.000000e+00 : f32
    %14 = vector.broadcast %cst_9 : f32 to vector<2x32xf32>
    %15 = arith.addf %14, %13 : vector<2x32xf32>
    %16 = arith.divf %14, %15 : vector<2x32xf32>
    %17 = vector.extract_strided_slice %10 {offsets = [0, 32], sizes = [2, 32], strides = [1, 1]} : vector<2x128xf32> to vector<2x32xf32>
    %18 = arith.negf %17 : vector<2x32xf32>
    %19 = math.exp %18 : vector<2x32xf32>
    %cst_10 = arith.constant 1.000000e+00 : f32
    %20 = vector.broadcast %cst_10 : f32 to vector<2x32xf32>
    %21 = arith.addf %20, %19 : vector<2x32xf32>
    %22 = arith.divf %20, %21 : vector<2x32xf32>
    %23 = vector.extract_strided_slice %10 {offsets = [0, 64], sizes = [2, 32], strides = [1, 1]} : vector<2x128xf32> to vector<2x32xf32>
    %24 = math.tanh %23 : vector<2x32xf32>
    %25 = vector.extract_strided_slice %10 {offsets = [0, 96], sizes = [2, 32], strides = [1, 1]} : vector<2x128xf32> to vector<2x32xf32>
    %26 = arith.negf %25 : vector<2x32xf32>
    %27 = math.exp %26 : vector<2x32xf32>
    %cst_11 = arith.constant 1.000000e+00 : f32
    %28 = vector.broadcast %cst_11 : f32 to vector<2x32xf32>
    %29 = arith.addf %28, %27 : vector<2x32xf32>
    %30 = arith.divf %28, %29 : vector<2x32xf32>
    %31 = arith.mulf %22, %8 : vector<2x32xf32>
    %32 = arith.mulf %16, %24 : vector<2x32xf32>
    %33 = arith.addf %31, %32 : vector<2x32xf32>
    %34 = math.tanh %33 : vector<2x32xf32>
    %35 = arith.mulf %30, %34 : vector<2x32xf32>
    %c0_12 = arith.constant 0 : index
    %c0_13 = arith.constant 0 : index
    %36 = vector.load %arg4[%c0_12, %c0_13] : memref<2x32xf32, #tpu.memory_space<vmem>>, vector<2x32xf32>
    tpu.vector_store %arg4[%c0_12, %c0_13], %35 {strides = array<i32>} : memref<2x32xf32, #tpu.memory_space<vmem>>, vector<2x32xf32>,
    %c0_14 = arith.constant 0 : index
    %c0_15 = arith.constant 0 : index
    %37 = vector.load %arg5[%c0_14, %c0_15] : memref<2x32xf32, #tpu.memory_space<vmem>>, vector<2x32xf32>
    tpu.vector_store %arg5[%c0_14, %c0_15], %33 {strides = array<i32>} : memref<2x32xf32, #tpu.memory_space<vmem>>, vector<2x32xf32>,
    %38 = arith.index_cast %c0_i32_2 : i32 to index
    %c0_16 = arith.constant 0 : index
    %c0_17 = arith.constant 0 : index
    %39 = vector.load %arg3[%38, %c0_16, %c0_17] : memref<8x2x32xf32, #tpu.memory_space<vmem>>, vector<1x2x32xf32>
    %40 = vector.shape_cast %39 : vector<1x2x32xf32> to vector<2x32xf32>
    %41 = vector.shape_cast %35 : vector<2x32xf32> to vector<1x2x32xf32>
    tpu.vector_store %arg3[%38, %c0_16, %c0_17], %41 {strides = array<i32>} : memref<8x2x32xf32, #tpu.memory_space<vmem>>, vector<1x2x32xf32>,
    %c1_i32 = arith.constant 1 : i32
    %42 = arith.index_cast %c1_i32 : i32 to index
    %c0_18 = arith.constant 0 : index
    %c0_19 = arith.constant 0 : index
    %43 = vector.load %arg1[%42, %c0_18, %c0_19] : memref<8x2x128xf32, #tpu.memory_space<vmem>>, vector<1x2x128xf32>
    %44 = vector.shape_cast %43 : vector<1x2x128xf32> to vector<2x128xf32>
    %c0_20 = arith.constant 0 : index
    %c0_21 = arith.constant 0 : index
    %45 = vector.load %arg4[%c0_20, %c0_21] : memref<2x32xf32, #tpu.memory_space<vmem>>, vector<2x32xf32>
    %c0_22 = arith.constant 0 : index
    %c0_23 = arith.constant 0 : index
    %46 = vector.load %arg5[%c0_22, %c0_23] : memref<2x32xf32, #tpu.memory_space<vmem>>, vector<2x32xf32>
    %cst_24 = arith.constant dense<0.000000e+00> : vector<2x128xf32>
    %47 = tpu.matmul %45, %3, %cst_24 {dimension_numbers = #tpu.dot_dimension_numbers<[1], [0], [0], [1], [0, 0, 1, 1], [], []>} : vector<2x32xf32>, vector<32x128xf32>, vector<2x128xf32> -> vector<2x128xf32>
    %48 = arith.addf %44, %47 : vector<2x128xf32>
    %49 = vector.extract_strided_slice %48 {offsets = [0, 0], sizes = [2, 32], strides = [1, 1]} : vector<2x128xf32> to vector<2x32xf32>
    %50 = arith.negf %49 : vector<2x32xf32>
    %51 = math.exp %50 : vector<2x32xf32>
    %cst_25 = arith.constant 1.000000e+00 : f32
    %52 = vector.broadcast %cst_25 : f32 to vector<2x32xf32>
    %53 = arith.addf %52, %51 : vector<2x32xf32>
    %54 = arith.divf %52, %53 : vector<2x32xf32>
    %55 = vector.extract_strided_slice %48 {offsets = [0, 32], sizes = [2, 32], strides = [1, 1]} : vector<2x128xf32> to vector<2x32xf32>
    %56 = arith.negf %55 : vector<2x32xf32>
    %57 = math.exp %56 : vector<2x32xf32>
    %cst_26 = arith.constant 1.000000e+00 : f32
    %58 = vector.broadcast %cst_26 : f32 to vector<2x32xf32>
    %59 = arith.addf %58, %57 : vector<2x32xf32>
    %60 = arith.divf %58, %59 : vector<2x32xf32>
    %61 = vector.extract_strided_slice %48 {offsets = [0, 64], sizes = [2, 32], strides = [1, 1]} : vector<2x128xf32> to vector<2x32xf32>
    %62 = math.tanh %61 : vector<2x32xf32>
    %63 = vector.extract_strided_slice %48 {offsets = [0, 96], sizes = [2, 32], strides = [1, 1]} : vector<2x128xf32> to vector<2x32xf32>
    %64 = arith.negf %63 : vector<2x32xf32>
    %65 = math.exp %64 : vector<2x32xf32>
    %cst_27 = arith.constant 1.000000e+00 : f32
    %66 = vector.broadcast %cst_27 : f32 to vector<2x32xf32>
    %67 = arith.addf %66, %65 : vector<2x32xf32>
    %68 = arith.divf %66, %67 : vector<2x32xf32>
    %69 = arith.mulf %60, %46 : vector<2x32xf32>
    %70 = arith.mulf %54, %62 : vector<2x32xf32>
    %71 = arith.addf %69, %70 : vector<2x32xf32>
    %72 = math.tanh %71 : vector<2x32xf32>
    %73 = arith.mulf %68, %72 : vector<2x32xf32>
    %c0_28 = arith.constant 0 : index
    %c0_29 = arith.constant 0 : index
    %74 = vector.load %arg4[%c0_28, %c0_29] : memref<2x32xf32, #tpu.memory_space<vmem>>, vector<2x32xf32>
    tpu.vector_store %arg4[%c0_28, %c0_29], %73 {strides = array<i32>} : memref<2x32xf32, #tpu.memory_space<vmem>>, vector<2x32xf32>,
    %c0_30 = arith.constant 0 : index
    %c0_31 = arith.constant 0 : index
    %75 = vector.load %arg5[%c0_30, %c0_31] : memref<2x32xf32, #tpu.memory_space<vmem>>, vector<2x32xf32>
    tpu.vector_store %arg5[%c0_30, %c0_31], %71 {strides = array<i32>} : memref<2x32xf32, #tpu.memory_space<vmem>>, vector<2x32xf32>,
    %76 = arith.index_cast %c1_i32 : i32 to index
    %c0_32 = arith.constant 0 : index
    %c0_33 = arith.constant 0 : index
    %77 = vector.load %arg3[%76, %c0_32, %c0_33] : memref<8x2x32xf32, #tpu.memory_space<vmem>>, vector<1x2x32xf32>
    %78 = vector.shape_cast %77 : vector<1x2x32xf32> to vector<2x32xf32>
    %79 = vector.shape_cast %73 : vector<2x32xf32> to vector<1x2x32xf32>
    tpu.vector_store %arg3[%76, %c0_32, %c0_33], %79 {strides = array<i32>} : memref<8x2x32xf32, #tpu.memory_space<vmem>>, vector<1x2x32xf32>,
    %c2_i32 = arith.constant 2 : i32
    %80 = arith.index_cast %c2_i32 : i32 to index
    %c0_34 = arith.constant 0 : index
    %c0_35 = arith.constant 0 : index
    %81 = vector.load %arg1[%80, %c0_34, %c0_35] : memref<8x2x128xf32, #tpu.memory_space<vmem>>, vector<1x2x128xf32>
    %82 = vector.shape_cast %81 : vector<1x2x128xf32> to vector<2x128xf32>
    %c0_36 = arith.constant 0 : index
    %c0_37 = arith.constant 0 : index
    %83 = vector.load %arg4[%c0_36, %c0_37] : memref<2x32xf32, #tpu.memory_space<vmem>>, vector<2x32xf32>
    %c0_38 = arith.constant 0 : index
    %c0_39 = arith.constant 0 : index
    %84 = vector.load %arg5[%c0_38, %c0_39] : memref<2x32xf32, #tpu.memory_space<vmem>>, vector<2x32xf32>
    %cst_40 = arith.constant dense<0.000000e+00> : vector<2x128xf32>
    %85 = tpu.matmul %83, %3, %cst_40 {dimension_numbers = #tpu.dot_dimension_numbers<[1], [0], [0], [1], [0, 0, 1, 1], [], []>} : vector<2x32xf32>, vector<32x128xf32>, vector<2x128xf32> -> vector<2x128xf32>
    %86 = arith.addf %82, %85 : vector<2x128xf32>
    %87 = vector.extract_strided_slice %86 {offsets = [0, 0], sizes = [2, 32], strides = [1, 1]} : vector<2x128xf32> to vector<2x32xf32>
    %88 = arith.negf %87 : vector<2x32xf32>
    %89 = math.exp %88 : vector<2x32xf32>
    %cst_41 = arith.constant 1.000000e+00 : f32
    %90 = vector.broadcast %cst_41 : f32 to vector<2x32xf32>
    %91 = arith.addf %90, %89 : vector<2x32xf32>
    %92 = arith.divf %90, %91 : vector<2x32xf32>
    %93 = vector.extract_strided_slice %86 {offsets = [0, 32], sizes = [2, 32], strides = [1, 1]} : vector<2x128xf32> to vector<2x32xf32>
    %94 = arith.negf %93 : vector<2x32xf32>
    %95 = math.exp %94 : vector<2x32xf32>
    %cst_42 = arith.constant 1.000000e+00 : f32
    %96 = vector.broadcast %cst_42 : f32 to vector<2x32xf32>
    %97 = arith.addf %96, %95 : vector<2x32xf32>
    %98 = arith.divf %96, %97 : vector<2x32xf32>
    %99 = vector.extract_strided_slice %86 {offsets = [0, 64], sizes = [2, 32], strides = [1, 1]} : vector<2x128xf32> to vector<2x32xf32>
    %100 = math.tanh %99 : vector<2x32xf32>
    %101 = vector.extract_strided_slice %86 {offsets = [0, 96], sizes = [2, 32], strides = [1, 1]} : vector<2x128xf32> to vector<2x32xf32>
    %102 = arith.negf %101 : vector<2x32xf32>
    %103 = math.exp %102 : vector<2x32xf32>
    %cst_43 = arith.constant 1.000000e+00 : f32
    %104 = vector.broadcast %cst_43 : f32 to vector<2x32xf32>
    %105 = arith.addf %104, %103 : vector<2x32xf32>
    %106 = arith.divf %104, %105 : vector<2x32xf32>
    %107 = arith.mulf %98, %84 : vector<2x32xf32>
    %108 = arith.mulf %92, %100 : vector<2x32xf32>
    %109 = arith.addf %107, %108 : vector<2x32xf32>
    %110 = math.tanh %109 : vector<2x32xf32>
    %111 = arith.mulf %106, %110 : vector<2x32xf32>
    %c0_44 = arith.constant 0 : index
    %c0_45 = arith.constant 0 : index
    %112 = vector.load %arg4[%c0_44, %c0_45] : memref<2x32xf32, #tpu.memory_space<vmem>>, vector<2x32xf32>
    tpu.vector_store %arg4[%c0_44, %c0_45], %111 {strides = array<i32>} : memref<2x32xf32, #tpu.memory_space<vmem>>, vector<2x32xf32>,
    %c0_46 = arith.constant 0 : index
    %c0_47 = arith.constant 0 : index
    %113 = vector.load %arg5[%c0_46, %c0_47] : memref<2x32xf32, #tpu.memory_space<vmem>>, vector<2x32xf32>
    tpu.vector_store %arg5[%c0_46, %c0_47], %109 {strides = array<i32>} : memref<2x32xf32, #tpu.memory_space<vmem>>, vector<2x32xf32>,
    %114 = arith.index_cast %c2_i32 : i32 to index
    %c0_48 = arith.constant 0 : index
    %c0_49 = arith.constant 0 : index
    %115 = vector.load %arg3[%114, %c0_48, %c0_49] : memref<8x2x32xf32, #tpu.memory_space<vmem>>, vector<1x2x32xf32>
    %116 = vector.shape_cast %115 : vector<1x2x32xf32> to vector<2x32xf32>
    %117 = vector.shape_cast %111 : vector<2x32xf32> to vector<1x2x32xf32>
    tpu.vector_store %arg3[%114, %c0_48, %c0_49], %117 {strides = array<i32>} : memref<8x2x32xf32, #tpu.memory_space<vmem>>, vector<1x2x32xf32>,
    %c3_i32 = arith.constant 3 : i32
    %118 = arith.index_cast %c3_i32 : i32 to index
    %c0_50 = arith.constant 0 : index
    %c0_51 = arith.constant 0 : index
    %119 = vector.load %arg1[%118, %c0_50, %c0_51] : memref<8x2x128xf32, #tpu.memory_space<vmem>>, vector<1x2x128xf32>
    %120 = vector.shape_cast %119 : vector<1x2x128xf32> to vector<2x128xf32>
    %c0_52 = arith.constant 0 : index
    %c0_53 = arith.constant 0 : index
    %121 = vector.load %arg4[%c0_52, %c0_53] : memref<2x32xf32, #tpu.memory_space<vmem>>, vector<2x32xf32>
    %c0_54 = arith.constant 0 : index
    %c0_55 = arith.constant 0 : index
    %122 = vector.load %arg5[%c0_54, %c0_55] : memref<2x32xf32, #tpu.memory_space<vmem>>, vector<2x32xf32>
    %cst_56 = arith.constant dense<0.000000e+00> : vector<2x128xf32>
    %123 = tpu.matmul %121, %3, %cst_56 {dimension_numbers = #tpu.dot_dimension_numbers<[1], [0], [0], [1], [0, 0, 1, 1], [], []>} : vector<2x32xf32>, vector<32x128xf32>, vector<2x128xf32> -> vector<2x128xf32>
    %124 = arith.addf %120, %123 : vector<2x128xf32>
    %125 = vector.extract_strided_slice %124 {offsets = [0, 0], sizes = [2, 32], strides = [1, 1]} : vector<2x128xf32> to vector<2x32xf32>
    %126 = arith.negf %125 : vector<2x32xf32>
    %127 = math.exp %126 : vector<2x32xf32>
    %cst_57 = arith.constant 1.000000e+00 : f32
    %128 = vector.broadcast %cst_57 : f32 to vector<2x32xf32>
    %129 = arith.addf %128, %127 : vector<2x32xf32>
    %130 = arith.divf %128, %129 : vector<2x32xf32>
    %131 = vector.extract_strided_slice %124 {offsets = [0, 32], sizes = [2, 32], strides = [1, 1]} : vector<2x128xf32> to vector<2x32xf32>
    %132 = arith.negf %131 : vector<2x32xf32>
    %133 = math.exp %132 : vector<2x32xf32>
    %cst_58 = arith.constant 1.000000e+00 : f32
    %134 = vector.broadcast %cst_58 : f32 to vector<2x32xf32>
    %135 = arith.addf %134, %133 : vector<2x32xf32>
    %136 = arith.divf %134, %135 : vector<2x32xf32>
    %137 = vector.extract_strided_slice %124 {offsets = [0, 64], sizes = [2, 32], strides = [1, 1]} : vector<2x128xf32> to vector<2x32xf32>
    %138 = math.tanh %137 : vector<2x32xf32>
    %139 = vector.extract_strided_slice %124 {offsets = [0, 96], sizes = [2, 32], strides = [1, 1]} : vector<2x128xf32> to vector<2x32xf32>
    %140 = arith.negf %139 : vector<2x32xf32>
    %141 = math.exp %140 : vector<2x32xf32>
    %cst_59 = arith.constant 1.000000e+00 : f32
    %142 = vector.broadcast %cst_59 : f32 to vector<2x32xf32>
    %143 = arith.addf %142, %141 : vector<2x32xf32>
    %144 = arith.divf %142, %143 : vector<2x32xf32>
    %145 = arith.mulf %136, %122 : vector<2x32xf32>
    %146 = arith.mulf %130, %138 : vector<2x32xf32>
    %147 = arith.addf %145, %146 : vector<2x32xf32>
    %148 = math.tanh %147 : vector<2x32xf32>
    %149 = arith.mulf %144, %148 : vector<2x32xf32>
    %c0_60 = arith.constant 0 : index
    %c0_61 = arith.constant 0 : index
    %150 = vector.load %arg4[%c0_60, %c0_61] : memref<2x32xf32, #tpu.memory_space<vmem>>, vector<2x32xf32>
    tpu.vector_store %arg4[%c0_60, %c0_61], %149 {strides = array<i32>} : memref<2x32xf32, #tpu.memory_space<vmem>>, vector<2x32xf32>,
    %c0_62 = arith.constant 0 : index
    %c0_63 = arith.constant 0 : index
    %151 = vector.load %arg5[%c0_62, %c0_63] : memref<2x32xf32, #tpu.memory_space<vmem>>, vector<2x32xf32>
    tpu.vector_store %arg5[%c0_62, %c0_63], %147 {strides = array<i32>} : memref<2x32xf32, #tpu.memory_space<vmem>>, vector<2x32xf32>,
    %152 = arith.index_cast %c3_i32 : i32 to index
    %c0_64 = arith.constant 0 : index
    %c0_65 = arith.constant 0 : index
    %153 = vector.load %arg3[%152, %c0_64, %c0_65] : memref<8x2x32xf32, #tpu.memory_space<vmem>>, vector<1x2x32xf32>
    %154 = vector.shape_cast %153 : vector<1x2x32xf32> to vector<2x32xf32>
    %155 = vector.shape_cast %149 : vector<2x32xf32> to vector<1x2x32xf32>
    tpu.vector_store %arg3[%152, %c0_64, %c0_65], %155 {strides = array<i32>} : memref<8x2x32xf32, #tpu.memory_space<vmem>>, vector<1x2x32xf32>,
    %c4_i32 = arith.constant 4 : i32
    %156 = arith.index_cast %c4_i32 : i32 to index
    %c0_66 = arith.constant 0 : index
    %c0_67 = arith.constant 0 : index
    %157 = vector.load %arg1[%156, %c0_66, %c0_67] : memref<8x2x128xf32, #tpu.memory_space<vmem>>, vector<1x2x128xf32>
    %158 = vector.shape_cast %157 : vector<1x2x128xf32> to vector<2x128xf32>
    %c0_68 = arith.constant 0 : index
    %c0_69 = arith.constant 0 : index
    %159 = vector.load %arg4[%c0_68, %c0_69] : memref<2x32xf32, #tpu.memory_space<vmem>>, vector<2x32xf32>
    %c0_70 = arith.constant 0 : index
    %c0_71 = arith.constant 0 : index
    %160 = vector.load %arg5[%c0_70, %c0_71] : memref<2x32xf32, #tpu.memory_space<vmem>>, vector<2x32xf32>
    %cst_72 = arith.constant dense<0.000000e+00> : vector<2x128xf32>
    %161 = tpu.matmul %159, %3, %cst_72 {dimension_numbers = #tpu.dot_dimension_numbers<[1], [0], [0], [1], [0, 0, 1, 1], [], []>} : vector<2x32xf32>, vector<32x128xf32>, vector<2x128xf32> -> vector<2x128xf32>
    %162 = arith.addf %158, %161 : vector<2x128xf32>
    %163 = vector.extract_strided_slice %162 {offsets = [0, 0], sizes = [2, 32], strides = [1, 1]} : vector<2x128xf32> to vector<2x32xf32>
    %164 = arith.negf %163 : vector<2x32xf32>
    %165 = math.exp %164 : vector<2x32xf32>
    %cst_73 = arith.constant 1.000000e+00 : f32
    %166 = vector.broadcast %cst_73 : f32 to vector<2x32xf32>
    %167 = arith.addf %166, %165 : vector<2x32xf32>
    %168 = arith.divf %166, %167 : vector<2x32xf32>
    %169 = vector.extract_strided_slice %162 {offsets = [0, 32], sizes = [2, 32], strides = [1, 1]} : vector<2x128xf32> to vector<2x32xf32>
    %170 = arith.negf %169 : vector<2x32xf32>
    %171 = math.exp %170 : vector<2x32xf32>
    %cst_74 = arith.constant 1.000000e+00 : f32
    %172 = vector.broadcast %cst_74 : f32 to vector<2x32xf32>
    %173 = arith.addf %172, %171 : vector<2x32xf32>
    %174 = arith.divf %172, %173 : vector<2x32xf32>
    %175 = vector.extract_strided_slice %162 {offsets = [0, 64], sizes = [2, 32], strides = [1, 1]} : vector<2x128xf32> to vector<2x32xf32>
    %176 = math.tanh %175 : vector<2x32xf32>
    %177 = vector.extract_strided_slice %162 {offsets = [0, 96], sizes = [2, 32], strides = [1, 1]} : vector<2x128xf32> to vector<2x32xf32>
    %178 = arith.negf %177 : vector<2x32xf32>
    %179 = math.exp %178 : vector<2x32xf32>
    %cst_75 = arith.constant 1.000000e+00 : f32
    %180 = vector.broadcast %cst_75 : f32 to vector<2x32xf32>
    %181 = arith.addf %180, %179 : vector<2x32xf32>
    %182 = arith.divf %180, %181 : vector<2x32xf32>
    %183 = arith.mulf %174, %160 : vector<2x32xf32>
    %184 = arith.mulf %168, %176 : vector<2x32xf32>
    %185 = arith.addf %183, %184 : vector<2x32xf32>
    %186 = math.tanh %185 : vector<2x32xf32>
    %187 = arith.mulf %182, %186 : vector<2x32xf32>
    %c0_76 = arith.constant 0 : index
    %c0_77 = arith.constant 0 : index
    %188 = vector.load %arg4[%c0_76, %c0_77] : memref<2x32xf32, #tpu.memory_space<vmem>>, vector<2x32xf32>
    tpu.vector_store %arg4[%c0_76, %c0_77], %187 {strides = array<i32>} : memref<2x32xf32, #tpu.memory_space<vmem>>, vector<2x32xf32>,
    %c0_78 = arith.constant 0 : index
    %c0_79 = arith.constant 0 : index
    %189 = vector.load %arg5[%c0_78, %c0_79] : memref<2x32xf32, #tpu.memory_space<vmem>>, vector<2x32xf32>
    tpu.vector_store %arg5[%c0_78, %c0_79], %185 {strides = array<i32>} : memref<2x32xf32, #tpu.memory_space<vmem>>, vector<2x32xf32>,
    %190 = arith.index_cast %c4_i32 : i32 to index
    %c0_80 = arith.constant 0 : index
    %c0_81 = arith.constant 0 : index
    %191 = vector.load %arg3[%190, %c0_80, %c0_81] : memref<8x2x32xf32, #tpu.memory_space<vmem>>, vector<1x2x32xf32>
    %192 = vector.shape_cast %191 : vector<1x2x32xf32> to vector<2x32xf32>
    %193 = vector.shape_cast %187 : vector<2x32xf32> to vector<1x2x32xf32>
    tpu.vector_store %arg3[%190, %c0_80, %c0_81], %193 {strides = array<i32>} : memref<8x2x32xf32, #tpu.memory_space<vmem>>, vector<1x2x32xf32>,
    %c5_i32 = arith.constant 5 : i32
    %194 = arith.index_cast %c5_i32 : i32 to index
    %c0_82 = arith.constant 0 : index
    %c0_83 = arith.constant 0 : index
    %195 = vector.load %arg1[%194, %c0_82, %c0_83] : memref<8x2x128xf32, #tpu.memory_space<vmem>>, vector<1x2x128xf32>
    %196 = vector.shape_cast %195 : vector<1x2x128xf32> to vector<2x128xf32>
    %c0_84 = arith.constant 0 : index
    %c0_85 = arith.constant 0 : index
    %197 = vector.load %arg4[%c0_84, %c0_85] : memref<2x32xf32, #tpu.memory_space<vmem>>, vector<2x32xf32>
    %c0_86 = arith.constant 0 : index
    %c0_87 = arith.constant 0 : index
    %198 = vector.load %arg5[%c0_86, %c0_87] : memref<2x32xf32, #tpu.memory_space<vmem>>, vector<2x32xf32>
    %cst_88 = arith.constant dense<0.000000e+00> : vector<2x128xf32>
    %199 = tpu.matmul %197, %3, %cst_88 {dimension_numbers = #tpu.dot_dimension_numbers<[1], [0], [0], [1], [0, 0, 1, 1], [], []>} : vector<2x32xf32>, vector<32x128xf32>, vector<2x128xf32> -> vector<2x128xf32>
    %200 = arith.addf %196, %199 : vector<2x128xf32>
    %201 = vector.extract_strided_slice %200 {offsets = [0, 0], sizes = [2, 32], strides = [1, 1]} : vector<2x128xf32> to vector<2x32xf32>
    %202 = arith.negf %201 : vector<2x32xf32>
    %203 = math.exp %202 : vector<2x32xf32>
    %cst_89 = arith.constant 1.000000e+00 : f32
    %204 = vector.broadcast %cst_89 : f32 to vector<2x32xf32>
    %205 = arith.addf %204, %203 : vector<2x32xf32>
    %206 = arith.divf %204, %205 : vector<2x32xf32>
    %207 = vector.extract_strided_slice %200 {offsets = [0, 32], sizes = [2, 32], strides = [1, 1]} : vector<2x128xf32> to vector<2x32xf32>
    %208 = arith.negf %207 : vector<2x32xf32>
    %209 = math.exp %208 : vector<2x32xf32>
    %cst_90 = arith.constant 1.000000e+00 : f32
    %210 = vector.broadcast %cst_90 : f32 to vector<2x32xf32>
    %211 = arith.addf %210, %209 : vector<2x32xf32>
    %212 = arith.divf %210, %211 : vector<2x32xf32>
    %213 = vector.extract_strided_slice %200 {offsets = [0, 64], sizes = [2, 32], strides = [1, 1]} : vector<2x128xf32> to vector<2x32xf32>
    %214 = math.tanh %213 : vector<2x32xf32>
    %215 = vector.extract_strided_slice %200 {offsets = [0, 96], sizes = [2, 32], strides = [1, 1]} : vector<2x128xf32> to vector<2x32xf32>
    %216 = arith.negf %215 : vector<2x32xf32>
    %217 = math.exp %216 : vector<2x32xf32>
    %cst_91 = arith.constant 1.000000e+00 : f32
    %218 = vector.broadcast %cst_91 : f32 to vector<2x32xf32>
    %219 = arith.addf %218, %217 : vector<2x32xf32>
    %220 = arith.divf %218, %219 : vector<2x32xf32>
    %221 = arith.mulf %212, %198 : vector<2x32xf32>
    %222 = arith.mulf %206, %214 : vector<2x32xf32>
    %223 = arith.addf %221, %222 : vector<2x32xf32>
    %224 = math.tanh %223 : vector<2x32xf32>
    %225 = arith.mulf %220, %224 : vector<2x32xf32>
    %c0_92 = arith.constant 0 : index
    %c0_93 = arith.constant 0 : index
    %226 = vector.load %arg4[%c0_92, %c0_93] : memref<2x32xf32, #tpu.memory_space<vmem>>, vector<2x32xf32>
    tpu.vector_store %arg4[%c0_92, %c0_93], %225 {strides = array<i32>} : memref<2x32xf32, #tpu.memory_space<vmem>>, vector<2x32xf32>,
    %c0_94 = arith.constant 0 : index
    %c0_95 = arith.constant 0 : index
    %227 = vector.load %arg5[%c0_94, %c0_95] : memref<2x32xf32, #tpu.memory_space<vmem>>, vector<2x32xf32>
    tpu.vector_store %arg5[%c0_94, %c0_95], %223 {strides = array<i32>} : memref<2x32xf32, #tpu.memory_space<vmem>>, vector<2x32xf32>,
    %228 = arith.index_cast %c5_i32 : i32 to index
    %c0_96 = arith.constant 0 : index
    %c0_97 = arith.constant 0 : index
    %229 = vector.load %arg3[%228, %c0_96, %c0_97] : memref<8x2x32xf32, #tpu.memory_space<vmem>>, vector<1x2x32xf32>
    %230 = vector.shape_cast %229 : vector<1x2x32xf32> to vector<2x32xf32>
    %231 = vector.shape_cast %225 : vector<2x32xf32> to vector<1x2x32xf32>
    tpu.vector_store %arg3[%228, %c0_96, %c0_97], %231 {strides = array<i32>} : memref<8x2x32xf32, #tpu.memory_space<vmem>>, vector<1x2x32xf32>,
    %c6_i32 = arith.constant 6 : i32
    %232 = arith.index_cast %c6_i32 : i32 to index
    %c0_98 = arith.constant 0 : index
    %c0_99 = arith.constant 0 : index
    %233 = vector.load %arg1[%232, %c0_98, %c0_99] : memref<8x2x128xf32, #tpu.memory_space<vmem>>, vector<1x2x128xf32>
    %234 = vector.shape_cast %233 : vector<1x2x128xf32> to vector<2x128xf32>
    %c0_100 = arith.constant 0 : index
    %c0_101 = arith.constant 0 : index
    %235 = vector.load %arg4[%c0_100, %c0_101] : memref<2x32xf32, #tpu.memory_space<vmem>>, vector<2x32xf32>
    %c0_102 = arith.constant 0 : index
    %c0_103 = arith.constant 0 : index
    %236 = vector.load %arg5[%c0_102, %c0_103] : memref<2x32xf32, #tpu.memory_space<vmem>>, vector<2x32xf32>
    %cst_104 = arith.constant dense<0.000000e+00> : vector<2x128xf32>
    %237 = tpu.matmul %235, %3, %cst_104 {dimension_numbers = #tpu.dot_dimension_numbers<[1], [0], [0], [1], [0, 0, 1, 1], [], []>} : vector<2x32xf32>, vector<32x128xf32>, vector<2x128xf32> -> vector<2x128xf32>
    %238 = arith.addf %234, %237 : vector<2x128xf32>
    %239 = vector.extract_strided_slice %238 {offsets = [0, 0], sizes = [2, 32], strides = [1, 1]} : vector<2x128xf32> to vector<2x32xf32>
    %240 = arith.negf %239 : vector<2x32xf32>
    %241 = math.exp %240 : vector<2x32xf32>
    %cst_105 = arith.constant 1.000000e+00 : f32
    %242 = vector.broadcast %cst_105 : f32 to vector<2x32xf32>
    %243 = arith.addf %242, %241 : vector<2x32xf32>
    %244 = arith.divf %242, %243 : vector<2x32xf32>
    %245 = vector.extract_strided_slice %238 {offsets = [0, 32], sizes = [2, 32], strides = [1, 1]} : vector<2x128xf32> to vector<2x32xf32>
    %246 = arith.negf %245 : vector<2x32xf32>
    %247 = math.exp %246 : vector<2x32xf32>
    %cst_106 = arith.constant 1.000000e+00 : f32
    %248 = vector.broadcast %cst_106 : f32 to vector<2x32xf32>
    %249 = arith.addf %248, %247 : vector<2x32xf32>
    %250 = arith.divf %248, %249 : vector<2x32xf32>
    %251 = vector.extract_strided_slice %238 {offsets = [0, 64], sizes = [2, 32], strides = [1, 1]} : vector<2x128xf32> to vector<2x32xf32>
    %252 = math.tanh %251 : vector<2x32xf32>
    %253 = vector.extract_strided_slice %238 {offsets = [0, 96], sizes = [2, 32], strides = [1, 1]} : vector<2x128xf32> to vector<2x32xf32>
    %254 = arith.negf %253 : vector<2x32xf32>
    %255 = math.exp %254 : vector<2x32xf32>
    %cst_107 = arith.constant 1.000000e+00 : f32
    %256 = vector.broadcast %cst_107 : f32 to vector<2x32xf32>
    %257 = arith.addf %256, %255 : vector<2x32xf32>
    %258 = arith.divf %256, %257 : vector<2x32xf32>
    %259 = arith.mulf %250, %236 : vector<2x32xf32>
    %260 = arith.mulf %244, %252 : vector<2x32xf32>
    %261 = arith.addf %259, %260 : vector<2x32xf32>
    %262 = math.tanh %261 : vector<2x32xf32>
    %263 = arith.mulf %258, %262 : vector<2x32xf32>
    %c0_108 = arith.constant 0 : index
    %c0_109 = arith.constant 0 : index
    %264 = vector.load %arg4[%c0_108, %c0_109] : memref<2x32xf32, #tpu.memory_space<vmem>>, vector<2x32xf32>
    tpu.vector_store %arg4[%c0_108, %c0_109], %263 {strides = array<i32>} : memref<2x32xf32, #tpu.memory_space<vmem>>, vector<2x32xf32>,
    %c0_110 = arith.constant 0 : index
    %c0_111 = arith.constant 0 : index
    %265 = vector.load %arg5[%c0_110, %c0_111] : memref<2x32xf32, #tpu.memory_space<vmem>>, vector<2x32xf32>
    tpu.vector_store %arg5[%c0_110, %c0_111], %261 {strides = array<i32>} : memref<2x32xf32, #tpu.memory_space<vmem>>, vector<2x32xf32>,
    %266 = arith.index_cast %c6_i32 : i32 to index
    %c0_112 = arith.constant 0 : index
    %c0_113 = arith.constant 0 : index
    %267 = vector.load %arg3[%266, %c0_112, %c0_113] : memref<8x2x32xf32, #tpu.memory_space<vmem>>, vector<1x2x32xf32>
    %268 = vector.shape_cast %267 : vector<1x2x32xf32> to vector<2x32xf32>
    %269 = vector.shape_cast %263 : vector<2x32xf32> to vector<1x2x32xf32>
    tpu.vector_store %arg3[%266, %c0_112, %c0_113], %269 {strides = array<i32>} : memref<8x2x32xf32, #tpu.memory_space<vmem>>, vector<1x2x32xf32>,
    %c7_i32 = arith.constant 7 : i32
    %270 = arith.index_cast %c7_i32 : i32 to index
    %c0_114 = arith.constant 0 : index
    %c0_115 = arith.constant 0 : index
    %271 = vector.load %arg1[%270, %c0_114, %c0_115] : memref<8x2x128xf32, #tpu.memory_space<vmem>>, vector<1x2x128xf32>
    %272 = vector.shape_cast %271 : vector<1x2x128xf32> to vector<2x128xf32>
    %c0_116 = arith.constant 0 : index
    %c0_117 = arith.constant 0 : index
    %273 = vector.load %arg4[%c0_116, %c0_117] : memref<2x32xf32, #tpu.memory_space<vmem>>, vector<2x32xf32>
    %c0_118 = arith.constant 0 : index
    %c0_119 = arith.constant 0 : index
    %274 = vector.load %arg5[%c0_118, %c0_119] : memref<2x32xf32, #tpu.memory_space<vmem>>, vector<2x32xf32>
    %cst_120 = arith.constant dense<0.000000e+00> : vector<2x128xf32>
    %275 = tpu.matmul %273, %3, %cst_120 {dimension_numbers = #tpu.dot_dimension_numbers<[1], [0], [0], [1], [0, 0, 1, 1], [], []>} : vector<2x32xf32>, vector<32x128xf32>, vector<2x128xf32> -> vector<2x128xf32>
    %276 = arith.addf %272, %275 : vector<2x128xf32>
    %277 = vector.extract_strided_slice %276 {offsets = [0, 0], sizes = [2, 32], strides = [1, 1]} : vector<2x128xf32> to vector<2x32xf32>
    %278 = arith.negf %277 : vector<2x32xf32>
    %279 = math.exp %278 : vector<2x32xf32>
    %cst_121 = arith.constant 1.000000e+00 : f32
    %280 = vector.broadcast %cst_121 : f32 to vector<2x32xf32>
    %281 = arith.addf %280, %279 : vector<2x32xf32>
    %282 = arith.divf %280, %281 : vector<2x32xf32>
    %283 = vector.extract_strided_slice %276 {offsets = [0, 32], sizes = [2, 32], strides = [1, 1]} : vector<2x128xf32> to vector<2x32xf32>
    %284 = arith.negf %283 : vector<2x32xf32>
    %285 = math.exp %284 : vector<2x32xf32>
    %cst_122 = arith.constant 1.000000e+00 : f32
    %286 = vector.broadcast %cst_122 : f32 to vector<2x32xf32>
    %287 = arith.addf %286, %285 : vector<2x32xf32>
    %288 = arith.divf %286, %287 : vector<2x32xf32>
    %289 = vector.extract_strided_slice %276 {offsets = [0, 64], sizes = [2, 32], strides = [1, 1]} : vector<2x128xf32> to vector<2x32xf32>
    %290 = math.tanh %289 : vector<2x32xf32>
    %291 = vector.extract_strided_slice %276 {offsets = [0, 96], sizes = [2, 32], strides = [1, 1]} : vector<2x128xf32> to vector<2x32xf32>
    %292 = arith.negf %291 : vector<2x32xf32>
    %293 = math.exp %292 : vector<2x32xf32>
    %cst_123 = arith.constant 1.000000e+00 : f32
    %294 = vector.broadcast %cst_123 : f32 to vector<2x32xf32>
    %295 = arith.addf %294, %293 : vector<2x32xf32>
    %296 = arith.divf %294, %295 : vector<2x32xf32>
    %297 = arith.mulf %288, %274 : vector<2x32xf32>
    %298 = arith.mulf %282, %290 : vector<2x32xf32>
    %299 = arith.addf %297, %298 : vector<2x32xf32>
    %300 = math.tanh %299 : vector<2x32xf32>
    %301 = arith.mulf %296, %300 : vector<2x32xf32>
    %c0_124 = arith.constant 0 : index
    %c0_125 = arith.constant 0 : index
    %302 = vector.load %arg4[%c0_124, %c0_125] : memref<2x32xf32, #tpu.memory_space<vmem>>, vector<2x32xf32>
    tpu.vector_store %arg4[%c0_124, %c0_125], %301 {strides = array<i32>} : memref<2x32xf32, #tpu.memory_space<vmem>>, vector<2x32xf32>,
    %c0_126 = arith.constant 0 : index
    %c0_127 = arith.constant 0 : index
    %303 = vector.load %arg5[%c0_126, %c0_127] : memref<2x32xf32, #tpu.memory_space<vmem>>, vector<2x32xf32>
    tpu.vector_store %arg5[%c0_126, %c0_127], %299 {strides = array<i32>} : memref<2x32xf32, #tpu.memory_space<vmem>>, vector<2x32xf32>,
    %304 = arith.index_cast %c7_i32 : i32 to index
    %c0_128 = arith.constant 0 : index
    %c0_129 = arith.constant 0 : index
    %305 = vector.load %arg3[%304, %c0_128, %c0_129] : memref<8x2x32xf32, #tpu.memory_space<vmem>>, vector<1x2x32xf32>
    %306 = vector.shape_cast %305 : vector<1x2x32xf32> to vector<2x32xf32>
    %307 = vector.shape_cast %301 : vector<2x32xf32> to vector<1x2x32xf32>
    tpu.vector_store %arg3[%304, %c0_128, %c0_129], %307 {strides = array<i32>} : memref<8x2x32xf32, #tpu.memory_space<vmem>>, vector<1x2x32xf32>,
    %c8_i32 = arith.constant 8 : i32
    return
  }
  func.func @transform_0(%arg0: i32) -> (i32, i32, i32) {
    %c0_i32 = arith.constant 0 : i32
    %c0_i32_0 = arith.constant 0 : i32
    %c0_i32_1 = arith.constant 0 : i32
    return %arg0, %c0_i32, %c0_i32_0 : i32, i32, i32
  }
  func.func @transform_1(%arg0: i32) -> (i32, i32) {
    %c0_i32 = arith.constant 0 : i32
    %c0_i32_0 = arith.constant 0 : i32
    %c0_i32_1 = arith.constant 0 : i32
    return %c0_i32, %c0_i32_0 : i32, i32
  }
  func.func @transform_2(%arg0: i32) -> (i32, i32, i32) {
    %c0_i32 = arith.constant 0 : i32
    %c0_i32_0 = arith.constant 0 : i32
    %c0_i32_1 = arith.constant 0 : i32
    return %arg0, %c0_i32, %c0_i32_0 : i32, i32, i32
  }
}

module attributes {stable_mosaic.version = 11 : i64} {
  func.func @_lstm_recurrent_fc_kernel(%arg0: i32, %arg1: memref<8x2x128xf32, #tpu.memory_space<vmem>>, %arg2: memref<32x128xf32, #tpu.memory_space<vmem>>, %arg3: memref<32x8xf32, #tpu.memory_space<vmem>>, %arg4: memref<1x8xf32, #tpu.memory_space<vmem>>, %arg5: memref<8x2x8xf32, #tpu.memory_space<vmem>>, %arg6: memref<2x32xf32, #tpu.memory_space<vmem>>, %arg7: memref<2x32xf32, #tpu.memory_space<vmem>>, %arg8: memref<8x2x32xf32, #tpu.memory_space<vmem>>) attributes {dimension_semantics = [#tpu.dimension_semantics<arbitrary>], iteration_bounds = array<i64: 1>, scalar_prefetch = 0 : i64, scratch_operands = 3 : i64, tpu.core_type = #tpu.core_type<tc>, window_params = [{transform_indices = @transform_0, window_bounds = array<i64: 8, 2, 128>}, {pipeline_mode = #tpu.pipeline_mode<synchronous>, transform_indices = @transform_1, window_bounds = array<i64: 32, 128>}, {pipeline_mode = #tpu.pipeline_mode<synchronous>, transform_indices = @transform_2, window_bounds = array<i64: 32, 8>}, {pipeline_mode = #tpu.pipeline_mode<synchronous>, transform_indices = @transform_3, window_bounds = array<i64: 1, 8>}, {transform_indices = @transform_4, window_bounds = array<i64: 8, 2, 8>}]} {
    %c0_i32 = arith.constant 0 : i32
    %0 = arith.cmpi eq, %arg0, %c0_i32 : i32
    %1 = arith.extui %0 : i1 to i32
    %c0_i32_0 = arith.constant 0 : i32
    %2 = arith.cmpi ne, %1, %c0_i32_0 : i32
    scf.if %2 {
      %cst_141 = arith.constant 0.000000e+00 : f32
      %317 = vector.broadcast %cst_141 : f32 to vector<2x32xf32>
      %c0_142 = arith.constant 0 : index
      %c0_143 = arith.constant 0 : index
      %318 = vector.load %arg6[%c0_142, %c0_143] : memref<2x32xf32, #tpu.memory_space<vmem>>, vector<2x32xf32>
      tpu.vector_store %arg6[%c0_142, %c0_143], %317 {strides = array<i32>} : memref<2x32xf32, #tpu.memory_space<vmem>>, vector<2x32xf32>,
      %cst_144 = arith.constant 0.000000e+00 : f32
      %319 = vector.broadcast %cst_144 : f32 to vector<2x32xf32>
      %c0_145 = arith.constant 0 : index
      %c0_146 = arith.constant 0 : index
      %320 = vector.load %arg7[%c0_145, %c0_146] : memref<2x32xf32, #tpu.memory_space<vmem>>, vector<2x32xf32>
      tpu.vector_store %arg7[%c0_145, %c0_146], %319 {strides = array<i32>} : memref<2x32xf32, #tpu.memory_space<vmem>>, vector<2x32xf32>,
    } else {
    }
    %c0 = arith.constant 0 : index
    %c0_1 = arith.constant 0 : index
    %3 = vector.load %arg2[%c0, %c0_1] : memref<32x128xf32, #tpu.memory_space<vmem>>, vector<32x128xf32>
    %c0_i32_2 = arith.constant 0 : i32
    %4 = arith.index_cast %c0_i32_2 : i32 to index
    %c0_3 = arith.constant 0 : index
    %c0_4 = arith.constant 0 : index
    %5 = vector.load %arg1[%4, %c0_3, %c0_4] : memref<8x2x128xf32, #tpu.memory_space<vmem>>, vector<1x2x128xf32>
    %6 = vector.shape_cast %5 : vector<1x2x128xf32> to vector<2x128xf32>
    %c0_5 = arith.constant 0 : index
    %c0_6 = arith.constant 0 : index
    %7 = vector.load %arg6[%c0_5, %c0_6] : memref<2x32xf32, #tpu.memory_space<vmem>>, vector<2x32xf32>
    %c0_7 = arith.constant 0 : index
    %c0_8 = arith.constant 0 : index
    %8 = vector.load %arg7[%c0_7, %c0_8] : memref<2x32xf32, #tpu.memory_space<vmem>>, vector<2x32xf32>
    %cst = arith.constant dense<0.000000e+00> : vector<2x128xf32>
    %9 = tpu.matmul %7, %3, %cst {dimension_numbers = #tpu.dot_dimension_numbers<[1], [0], [0], [1], [0, 0, 1, 1], [], []>} : vector<2x32xf32>, vector<32x128xf32>, vector<2x128xf32> -> vector<2x128xf32>
    %10 = arith.addf %6, %9 : vector<2x128xf32>
    %11 = vector.extract_strided_slice %10 {offsets = [0, 0], sizes = [2, 32], strides = [1, 1]} : vector<2x128xf32> to vector<2x32xf32>
    %12 = arith.negf %11 : vector<2x32xf32>
    %13 = math.exp %12 : vector<2x32xf32>
    %cst_9 = arith.constant 1.000000e+00 : f32
    %14 = vector.broadcast %cst_9 : f32 to vector<2x32xf32>
    %15 = arith.addf %14, %13 : vector<2x32xf32>
    %16 = arith.divf %14, %15 : vector<2x32xf32>
    %17 = vector.extract_strided_slice %10 {offsets = [0, 32], sizes = [2, 32], strides = [1, 1]} : vector<2x128xf32> to vector<2x32xf32>
    %18 = arith.negf %17 : vector<2x32xf32>
    %19 = math.exp %18 : vector<2x32xf32>
    %cst_10 = arith.constant 1.000000e+00 : f32
    %20 = vector.broadcast %cst_10 : f32 to vector<2x32xf32>
    %21 = arith.addf %20, %19 : vector<2x32xf32>
    %22 = arith.divf %20, %21 : vector<2x32xf32>
    %23 = vector.extract_strided_slice %10 {offsets = [0, 64], sizes = [2, 32], strides = [1, 1]} : vector<2x128xf32> to vector<2x32xf32>
    %24 = math.tanh %23 : vector<2x32xf32>
    %25 = vector.extract_strided_slice %10 {offsets = [0, 96], sizes = [2, 32], strides = [1, 1]} : vector<2x128xf32> to vector<2x32xf32>
    %26 = arith.negf %25 : vector<2x32xf32>
    %27 = math.exp %26 : vector<2x32xf32>
    %cst_11 = arith.constant 1.000000e+00 : f32
    %28 = vector.broadcast %cst_11 : f32 to vector<2x32xf32>
    %29 = arith.addf %28, %27 : vector<2x32xf32>
    %30 = arith.divf %28, %29 : vector<2x32xf32>
    %31 = arith.mulf %22, %8 : vector<2x32xf32>
    %32 = arith.mulf %16, %24 : vector<2x32xf32>
    %33 = arith.addf %31, %32 : vector<2x32xf32>
    %34 = math.tanh %33 : vector<2x32xf32>
    %35 = arith.mulf %30, %34 : vector<2x32xf32>
    %c0_12 = arith.constant 0 : index
    %c0_13 = arith.constant 0 : index
    %36 = vector.load %arg6[%c0_12, %c0_13] : memref<2x32xf32, #tpu.memory_space<vmem>>, vector<2x32xf32>
    tpu.vector_store %arg6[%c0_12, %c0_13], %35 {strides = array<i32>} : memref<2x32xf32, #tpu.memory_space<vmem>>, vector<2x32xf32>,
    %c0_14 = arith.constant 0 : index
    %c0_15 = arith.constant 0 : index
    %37 = vector.load %arg7[%c0_14, %c0_15] : memref<2x32xf32, #tpu.memory_space<vmem>>, vector<2x32xf32>
    tpu.vector_store %arg7[%c0_14, %c0_15], %33 {strides = array<i32>} : memref<2x32xf32, #tpu.memory_space<vmem>>, vector<2x32xf32>,
    %38 = arith.index_cast %c0_i32_2 : i32 to index
    %c0_16 = arith.constant 0 : index
    %c0_17 = arith.constant 0 : index
    %39 = vector.load %arg8[%38, %c0_16, %c0_17] : memref<8x2x32xf32, #tpu.memory_space<vmem>>, vector<1x2x32xf32>
    %40 = vector.shape_cast %39 : vector<1x2x32xf32> to vector<2x32xf32>
    %41 = vector.shape_cast %35 : vector<2x32xf32> to vector<1x2x32xf32>
    tpu.vector_store %arg8[%38, %c0_16, %c0_17], %41 {strides = array<i32>} : memref<8x2x32xf32, #tpu.memory_space<vmem>>, vector<1x2x32xf32>,
    %c1_i32 = arith.constant 1 : i32
    %42 = arith.index_cast %c1_i32 : i32 to index
    %c0_18 = arith.constant 0 : index
    %c0_19 = arith.constant 0 : index
    %43 = vector.load %arg1[%42, %c0_18, %c0_19] : memref<8x2x128xf32, #tpu.memory_space<vmem>>, vector<1x2x128xf32>
    %44 = vector.shape_cast %43 : vector<1x2x128xf32> to vector<2x128xf32>
    %c0_20 = arith.constant 0 : index
    %c0_21 = arith.constant 0 : index
    %45 = vector.load %arg6[%c0_20, %c0_21] : memref<2x32xf32, #tpu.memory_space<vmem>>, vector<2x32xf32>
    %c0_22 = arith.constant 0 : index
    %c0_23 = arith.constant 0 : index
    %46 = vector.load %arg7[%c0_22, %c0_23] : memref<2x32xf32, #tpu.memory_space<vmem>>, vector<2x32xf32>
    %cst_24 = arith.constant dense<0.000000e+00> : vector<2x128xf32>
    %47 = tpu.matmul %45, %3, %cst_24 {dimension_numbers = #tpu.dot_dimension_numbers<[1], [0], [0], [1], [0, 0, 1, 1], [], []>} : vector<2x32xf32>, vector<32x128xf32>, vector<2x128xf32> -> vector<2x128xf32>
    %48 = arith.addf %44, %47 : vector<2x128xf32>
    %49 = vector.extract_strided_slice %48 {offsets = [0, 0], sizes = [2, 32], strides = [1, 1]} : vector<2x128xf32> to vector<2x32xf32>
    %50 = arith.negf %49 : vector<2x32xf32>
    %51 = math.exp %50 : vector<2x32xf32>
    %cst_25 = arith.constant 1.000000e+00 : f32
    %52 = vector.broadcast %cst_25 : f32 to vector<2x32xf32>
    %53 = arith.addf %52, %51 : vector<2x32xf32>
    %54 = arith.divf %52, %53 : vector<2x32xf32>
    %55 = vector.extract_strided_slice %48 {offsets = [0, 32], sizes = [2, 32], strides = [1, 1]} : vector<2x128xf32> to vector<2x32xf32>
    %56 = arith.negf %55 : vector<2x32xf32>
    %57 = math.exp %56 : vector<2x32xf32>
    %cst_26 = arith.constant 1.000000e+00 : f32
    %58 = vector.broadcast %cst_26 : f32 to vector<2x32xf32>
    %59 = arith.addf %58, %57 : vector<2x32xf32>
    %60 = arith.divf %58, %59 : vector<2x32xf32>
    %61 = vector.extract_strided_slice %48 {offsets = [0, 64], sizes = [2, 32], strides = [1, 1]} : vector<2x128xf32> to vector<2x32xf32>
    %62 = math.tanh %61 : vector<2x32xf32>
    %63 = vector.extract_strided_slice %48 {offsets = [0, 96], sizes = [2, 32], strides = [1, 1]} : vector<2x128xf32> to vector<2x32xf32>
    %64 = arith.negf %63 : vector<2x32xf32>
    %65 = math.exp %64 : vector<2x32xf32>
    %cst_27 = arith.constant 1.000000e+00 : f32
    %66 = vector.broadcast %cst_27 : f32 to vector<2x32xf32>
    %67 = arith.addf %66, %65 : vector<2x32xf32>
    %68 = arith.divf %66, %67 : vector<2x32xf32>
    %69 = arith.mulf %60, %46 : vector<2x32xf32>
    %70 = arith.mulf %54, %62 : vector<2x32xf32>
    %71 = arith.addf %69, %70 : vector<2x32xf32>
    %72 = math.tanh %71 : vector<2x32xf32>
    %73 = arith.mulf %68, %72 : vector<2x32xf32>
    %c0_28 = arith.constant 0 : index
    %c0_29 = arith.constant 0 : index
    %74 = vector.load %arg6[%c0_28, %c0_29] : memref<2x32xf32, #tpu.memory_space<vmem>>, vector<2x32xf32>
    tpu.vector_store %arg6[%c0_28, %c0_29], %73 {strides = array<i32>} : memref<2x32xf32, #tpu.memory_space<vmem>>, vector<2x32xf32>,
    %c0_30 = arith.constant 0 : index
    %c0_31 = arith.constant 0 : index
    %75 = vector.load %arg7[%c0_30, %c0_31] : memref<2x32xf32, #tpu.memory_space<vmem>>, vector<2x32xf32>
    tpu.vector_store %arg7[%c0_30, %c0_31], %71 {strides = array<i32>} : memref<2x32xf32, #tpu.memory_space<vmem>>, vector<2x32xf32>,
    %76 = arith.index_cast %c1_i32 : i32 to index
    %c0_32 = arith.constant 0 : index
    %c0_33 = arith.constant 0 : index
    %77 = vector.load %arg8[%76, %c0_32, %c0_33] : memref<8x2x32xf32, #tpu.memory_space<vmem>>, vector<1x2x32xf32>
    %78 = vector.shape_cast %77 : vector<1x2x32xf32> to vector<2x32xf32>
    %79 = vector.shape_cast %73 : vector<2x32xf32> to vector<1x2x32xf32>
    tpu.vector_store %arg8[%76, %c0_32, %c0_33], %79 {strides = array<i32>} : memref<8x2x32xf32, #tpu.memory_space<vmem>>, vector<1x2x32xf32>,
    %c2_i32 = arith.constant 2 : i32
    %80 = arith.index_cast %c2_i32 : i32 to index
    %c0_34 = arith.constant 0 : index
    %c0_35 = arith.constant 0 : index
    %81 = vector.load %arg1[%80, %c0_34, %c0_35] : memref<8x2x128xf32, #tpu.memory_space<vmem>>, vector<1x2x128xf32>
    %82 = vector.shape_cast %81 : vector<1x2x128xf32> to vector<2x128xf32>
    %c0_36 = arith.constant 0 : index
    %c0_37 = arith.constant 0 : index
    %83 = vector.load %arg6[%c0_36, %c0_37] : memref<2x32xf32, #tpu.memory_space<vmem>>, vector<2x32xf32>
    %c0_38 = arith.constant 0 : index
    %c0_39 = arith.constant 0 : index
    %84 = vector.load %arg7[%c0_38, %c0_39] : memref<2x32xf32, #tpu.memory_space<vmem>>, vector<2x32xf32>
    %cst_40 = arith.constant dense<0.000000e+00> : vector<2x128xf32>
    %85 = tpu.matmul %83, %3, %cst_40 {dimension_numbers = #tpu.dot_dimension_numbers<[1], [0], [0], [1], [0, 0, 1, 1], [], []>} : vector<2x32xf32>, vector<32x128xf32>, vector<2x128xf32> -> vector<2x128xf32>
    %86 = arith.addf %82, %85 : vector<2x128xf32>
    %87 = vector.extract_strided_slice %86 {offsets = [0, 0], sizes = [2, 32], strides = [1, 1]} : vector<2x128xf32> to vector<2x32xf32>
    %88 = arith.negf %87 : vector<2x32xf32>
    %89 = math.exp %88 : vector<2x32xf32>
    %cst_41 = arith.constant 1.000000e+00 : f32
    %90 = vector.broadcast %cst_41 : f32 to vector<2x32xf32>
    %91 = arith.addf %90, %89 : vector<2x32xf32>
    %92 = arith.divf %90, %91 : vector<2x32xf32>
    %93 = vector.extract_strided_slice %86 {offsets = [0, 32], sizes = [2, 32], strides = [1, 1]} : vector<2x128xf32> to vector<2x32xf32>
    %94 = arith.negf %93 : vector<2x32xf32>
    %95 = math.exp %94 : vector<2x32xf32>
    %cst_42 = arith.constant 1.000000e+00 : f32
    %96 = vector.broadcast %cst_42 : f32 to vector<2x32xf32>
    %97 = arith.addf %96, %95 : vector<2x32xf32>
    %98 = arith.divf %96, %97 : vector<2x32xf32>
    %99 = vector.extract_strided_slice %86 {offsets = [0, 64], sizes = [2, 32], strides = [1, 1]} : vector<2x128xf32> to vector<2x32xf32>
    %100 = math.tanh %99 : vector<2x32xf32>
    %101 = vector.extract_strided_slice %86 {offsets = [0, 96], sizes = [2, 32], strides = [1, 1]} : vector<2x128xf32> to vector<2x32xf32>
    %102 = arith.negf %101 : vector<2x32xf32>
    %103 = math.exp %102 : vector<2x32xf32>
    %cst_43 = arith.constant 1.000000e+00 : f32
    %104 = vector.broadcast %cst_43 : f32 to vector<2x32xf32>
    %105 = arith.addf %104, %103 : vector<2x32xf32>
    %106 = arith.divf %104, %105 : vector<2x32xf32>
    %107 = arith.mulf %98, %84 : vector<2x32xf32>
    %108 = arith.mulf %92, %100 : vector<2x32xf32>
    %109 = arith.addf %107, %108 : vector<2x32xf32>
    %110 = math.tanh %109 : vector<2x32xf32>
    %111 = arith.mulf %106, %110 : vector<2x32xf32>
    %c0_44 = arith.constant 0 : index
    %c0_45 = arith.constant 0 : index
    %112 = vector.load %arg6[%c0_44, %c0_45] : memref<2x32xf32, #tpu.memory_space<vmem>>, vector<2x32xf32>
    tpu.vector_store %arg6[%c0_44, %c0_45], %111 {strides = array<i32>} : memref<2x32xf32, #tpu.memory_space<vmem>>, vector<2x32xf32>,
    %c0_46 = arith.constant 0 : index
    %c0_47 = arith.constant 0 : index
    %113 = vector.load %arg7[%c0_46, %c0_47] : memref<2x32xf32, #tpu.memory_space<vmem>>, vector<2x32xf32>
    tpu.vector_store %arg7[%c0_46, %c0_47], %109 {strides = array<i32>} : memref<2x32xf32, #tpu.memory_space<vmem>>, vector<2x32xf32>,
    %114 = arith.index_cast %c2_i32 : i32 to index
    %c0_48 = arith.constant 0 : index
    %c0_49 = arith.constant 0 : index
    %115 = vector.load %arg8[%114, %c0_48, %c0_49] : memref<8x2x32xf32, #tpu.memory_space<vmem>>, vector<1x2x32xf32>
    %116 = vector.shape_cast %115 : vector<1x2x32xf32> to vector<2x32xf32>
    %117 = vector.shape_cast %111 : vector<2x32xf32> to vector<1x2x32xf32>
    tpu.vector_store %arg8[%114, %c0_48, %c0_49], %117 {strides = array<i32>} : memref<8x2x32xf32, #tpu.memory_space<vmem>>, vector<1x2x32xf32>,
    %c3_i32 = arith.constant 3 : i32
    %118 = arith.index_cast %c3_i32 : i32 to index
    %c0_50 = arith.constant 0 : index
    %c0_51 = arith.constant 0 : index
    %119 = vector.load %arg1[%118, %c0_50, %c0_51] : memref<8x2x128xf32, #tpu.memory_space<vmem>>, vector<1x2x128xf32>
    %120 = vector.shape_cast %119 : vector<1x2x128xf32> to vector<2x128xf32>
    %c0_52 = arith.constant 0 : index
    %c0_53 = arith.constant 0 : index
    %121 = vector.load %arg6[%c0_52, %c0_53] : memref<2x32xf32, #tpu.memory_space<vmem>>, vector<2x32xf32>
    %c0_54 = arith.constant 0 : index
    %c0_55 = arith.constant 0 : index
    %122 = vector.load %arg7[%c0_54, %c0_55] : memref<2x32xf32, #tpu.memory_space<vmem>>, vector<2x32xf32>
    %cst_56 = arith.constant dense<0.000000e+00> : vector<2x128xf32>
    %123 = tpu.matmul %121, %3, %cst_56 {dimension_numbers = #tpu.dot_dimension_numbers<[1], [0], [0], [1], [0, 0, 1, 1], [], []>} : vector<2x32xf32>, vector<32x128xf32>, vector<2x128xf32> -> vector<2x128xf32>
    %124 = arith.addf %120, %123 : vector<2x128xf32>
    %125 = vector.extract_strided_slice %124 {offsets = [0, 0], sizes = [2, 32], strides = [1, 1]} : vector<2x128xf32> to vector<2x32xf32>
    %126 = arith.negf %125 : vector<2x32xf32>
    %127 = math.exp %126 : vector<2x32xf32>
    %cst_57 = arith.constant 1.000000e+00 : f32
    %128 = vector.broadcast %cst_57 : f32 to vector<2x32xf32>
    %129 = arith.addf %128, %127 : vector<2x32xf32>
    %130 = arith.divf %128, %129 : vector<2x32xf32>
    %131 = vector.extract_strided_slice %124 {offsets = [0, 32], sizes = [2, 32], strides = [1, 1]} : vector<2x128xf32> to vector<2x32xf32>
    %132 = arith.negf %131 : vector<2x32xf32>
    %133 = math.exp %132 : vector<2x32xf32>
    %cst_58 = arith.constant 1.000000e+00 : f32
    %134 = vector.broadcast %cst_58 : f32 to vector<2x32xf32>
    %135 = arith.addf %134, %133 : vector<2x32xf32>
    %136 = arith.divf %134, %135 : vector<2x32xf32>
    %137 = vector.extract_strided_slice %124 {offsets = [0, 64], sizes = [2, 32], strides = [1, 1]} : vector<2x128xf32> to vector<2x32xf32>
    %138 = math.tanh %137 : vector<2x32xf32>
    %139 = vector.extract_strided_slice %124 {offsets = [0, 96], sizes = [2, 32], strides = [1, 1]} : vector<2x128xf32> to vector<2x32xf32>
    %140 = arith.negf %139 : vector<2x32xf32>
    %141 = math.exp %140 : vector<2x32xf32>
    %cst_59 = arith.constant 1.000000e+00 : f32
    %142 = vector.broadcast %cst_59 : f32 to vector<2x32xf32>
    %143 = arith.addf %142, %141 : vector<2x32xf32>
    %144 = arith.divf %142, %143 : vector<2x32xf32>
    %145 = arith.mulf %136, %122 : vector<2x32xf32>
    %146 = arith.mulf %130, %138 : vector<2x32xf32>
    %147 = arith.addf %145, %146 : vector<2x32xf32>
    %148 = math.tanh %147 : vector<2x32xf32>
    %149 = arith.mulf %144, %148 : vector<2x32xf32>
    %c0_60 = arith.constant 0 : index
    %c0_61 = arith.constant 0 : index
    %150 = vector.load %arg6[%c0_60, %c0_61] : memref<2x32xf32, #tpu.memory_space<vmem>>, vector<2x32xf32>
    tpu.vector_store %arg6[%c0_60, %c0_61], %149 {strides = array<i32>} : memref<2x32xf32, #tpu.memory_space<vmem>>, vector<2x32xf32>,
    %c0_62 = arith.constant 0 : index
    %c0_63 = arith.constant 0 : index
    %151 = vector.load %arg7[%c0_62, %c0_63] : memref<2x32xf32, #tpu.memory_space<vmem>>, vector<2x32xf32>
    tpu.vector_store %arg7[%c0_62, %c0_63], %147 {strides = array<i32>} : memref<2x32xf32, #tpu.memory_space<vmem>>, vector<2x32xf32>,
    %152 = arith.index_cast %c3_i32 : i32 to index
    %c0_64 = arith.constant 0 : index
    %c0_65 = arith.constant 0 : index
    %153 = vector.load %arg8[%152, %c0_64, %c0_65] : memref<8x2x32xf32, #tpu.memory_space<vmem>>, vector<1x2x32xf32>
    %154 = vector.shape_cast %153 : vector<1x2x32xf32> to vector<2x32xf32>
    %155 = vector.shape_cast %149 : vector<2x32xf32> to vector<1x2x32xf32>
    tpu.vector_store %arg8[%152, %c0_64, %c0_65], %155 {strides = array<i32>} : memref<8x2x32xf32, #tpu.memory_space<vmem>>, vector<1x2x32xf32>,
    %c4_i32 = arith.constant 4 : i32
    %156 = arith.index_cast %c4_i32 : i32 to index
    %c0_66 = arith.constant 0 : index
    %c0_67 = arith.constant 0 : index
    %157 = vector.load %arg1[%156, %c0_66, %c0_67] : memref<8x2x128xf32, #tpu.memory_space<vmem>>, vector<1x2x128xf32>
    %158 = vector.shape_cast %157 : vector<1x2x128xf32> to vector<2x128xf32>
    %c0_68 = arith.constant 0 : index
    %c0_69 = arith.constant 0 : index
    %159 = vector.load %arg6[%c0_68, %c0_69] : memref<2x32xf32, #tpu.memory_space<vmem>>, vector<2x32xf32>
    %c0_70 = arith.constant 0 : index
    %c0_71 = arith.constant 0 : index
    %160 = vector.load %arg7[%c0_70, %c0_71] : memref<2x32xf32, #tpu.memory_space<vmem>>, vector<2x32xf32>
    %cst_72 = arith.constant dense<0.000000e+00> : vector<2x128xf32>
    %161 = tpu.matmul %159, %3, %cst_72 {dimension_numbers = #tpu.dot_dimension_numbers<[1], [0], [0], [1], [0, 0, 1, 1], [], []>} : vector<2x32xf32>, vector<32x128xf32>, vector<2x128xf32> -> vector<2x128xf32>
    %162 = arith.addf %158, %161 : vector<2x128xf32>
    %163 = vector.extract_strided_slice %162 {offsets = [0, 0], sizes = [2, 32], strides = [1, 1]} : vector<2x128xf32> to vector<2x32xf32>
    %164 = arith.negf %163 : vector<2x32xf32>
    %165 = math.exp %164 : vector<2x32xf32>
    %cst_73 = arith.constant 1.000000e+00 : f32
    %166 = vector.broadcast %cst_73 : f32 to vector<2x32xf32>
    %167 = arith.addf %166, %165 : vector<2x32xf32>
    %168 = arith.divf %166, %167 : vector<2x32xf32>
    %169 = vector.extract_strided_slice %162 {offsets = [0, 32], sizes = [2, 32], strides = [1, 1]} : vector<2x128xf32> to vector<2x32xf32>
    %170 = arith.negf %169 : vector<2x32xf32>
    %171 = math.exp %170 : vector<2x32xf32>
    %cst_74 = arith.constant 1.000000e+00 : f32
    %172 = vector.broadcast %cst_74 : f32 to vector<2x32xf32>
    %173 = arith.addf %172, %171 : vector<2x32xf32>
    %174 = arith.divf %172, %173 : vector<2x32xf32>
    %175 = vector.extract_strided_slice %162 {offsets = [0, 64], sizes = [2, 32], strides = [1, 1]} : vector<2x128xf32> to vector<2x32xf32>
    %176 = math.tanh %175 : vector<2x32xf32>
    %177 = vector.extract_strided_slice %162 {offsets = [0, 96], sizes = [2, 32], strides = [1, 1]} : vector<2x128xf32> to vector<2x32xf32>
    %178 = arith.negf %177 : vector<2x32xf32>
    %179 = math.exp %178 : vector<2x32xf32>
    %cst_75 = arith.constant 1.000000e+00 : f32
    %180 = vector.broadcast %cst_75 : f32 to vector<2x32xf32>
    %181 = arith.addf %180, %179 : vector<2x32xf32>
    %182 = arith.divf %180, %181 : vector<2x32xf32>
    %183 = arith.mulf %174, %160 : vector<2x32xf32>
    %184 = arith.mulf %168, %176 : vector<2x32xf32>
    %185 = arith.addf %183, %184 : vector<2x32xf32>
    %186 = math.tanh %185 : vector<2x32xf32>
    %187 = arith.mulf %182, %186 : vector<2x32xf32>
    %c0_76 = arith.constant 0 : index
    %c0_77 = arith.constant 0 : index
    %188 = vector.load %arg6[%c0_76, %c0_77] : memref<2x32xf32, #tpu.memory_space<vmem>>, vector<2x32xf32>
    tpu.vector_store %arg6[%c0_76, %c0_77], %187 {strides = array<i32>} : memref<2x32xf32, #tpu.memory_space<vmem>>, vector<2x32xf32>,
    %c0_78 = arith.constant 0 : index
    %c0_79 = arith.constant 0 : index
    %189 = vector.load %arg7[%c0_78, %c0_79] : memref<2x32xf32, #tpu.memory_space<vmem>>, vector<2x32xf32>
    tpu.vector_store %arg7[%c0_78, %c0_79], %185 {strides = array<i32>} : memref<2x32xf32, #tpu.memory_space<vmem>>, vector<2x32xf32>,
    %190 = arith.index_cast %c4_i32 : i32 to index
    %c0_80 = arith.constant 0 : index
    %c0_81 = arith.constant 0 : index
    %191 = vector.load %arg8[%190, %c0_80, %c0_81] : memref<8x2x32xf32, #tpu.memory_space<vmem>>, vector<1x2x32xf32>
    %192 = vector.shape_cast %191 : vector<1x2x32xf32> to vector<2x32xf32>
    %193 = vector.shape_cast %187 : vector<2x32xf32> to vector<1x2x32xf32>
    tpu.vector_store %arg8[%190, %c0_80, %c0_81], %193 {strides = array<i32>} : memref<8x2x32xf32, #tpu.memory_space<vmem>>, vector<1x2x32xf32>,
    %c5_i32 = arith.constant 5 : i32
    %194 = arith.index_cast %c5_i32 : i32 to index
    %c0_82 = arith.constant 0 : index
    %c0_83 = arith.constant 0 : index
    %195 = vector.load %arg1[%194, %c0_82, %c0_83] : memref<8x2x128xf32, #tpu.memory_space<vmem>>, vector<1x2x128xf32>
    %196 = vector.shape_cast %195 : vector<1x2x128xf32> to vector<2x128xf32>
    %c0_84 = arith.constant 0 : index
    %c0_85 = arith.constant 0 : index
    %197 = vector.load %arg6[%c0_84, %c0_85] : memref<2x32xf32, #tpu.memory_space<vmem>>, vector<2x32xf32>
    %c0_86 = arith.constant 0 : index
    %c0_87 = arith.constant 0 : index
    %198 = vector.load %arg7[%c0_86, %c0_87] : memref<2x32xf32, #tpu.memory_space<vmem>>, vector<2x32xf32>
    %cst_88 = arith.constant dense<0.000000e+00> : vector<2x128xf32>
    %199 = tpu.matmul %197, %3, %cst_88 {dimension_numbers = #tpu.dot_dimension_numbers<[1], [0], [0], [1], [0, 0, 1, 1], [], []>} : vector<2x32xf32>, vector<32x128xf32>, vector<2x128xf32> -> vector<2x128xf32>
    %200 = arith.addf %196, %199 : vector<2x128xf32>
    %201 = vector.extract_strided_slice %200 {offsets = [0, 0], sizes = [2, 32], strides = [1, 1]} : vector<2x128xf32> to vector<2x32xf32>
    %202 = arith.negf %201 : vector<2x32xf32>
    %203 = math.exp %202 : vector<2x32xf32>
    %cst_89 = arith.constant 1.000000e+00 : f32
    %204 = vector.broadcast %cst_89 : f32 to vector<2x32xf32>
    %205 = arith.addf %204, %203 : vector<2x32xf32>
    %206 = arith.divf %204, %205 : vector<2x32xf32>
    %207 = vector.extract_strided_slice %200 {offsets = [0, 32], sizes = [2, 32], strides = [1, 1]} : vector<2x128xf32> to vector<2x32xf32>
    %208 = arith.negf %207 : vector<2x32xf32>
    %209 = math.exp %208 : vector<2x32xf32>
    %cst_90 = arith.constant 1.000000e+00 : f32
    %210 = vector.broadcast %cst_90 : f32 to vector<2x32xf32>
    %211 = arith.addf %210, %209 : vector<2x32xf32>
    %212 = arith.divf %210, %211 : vector<2x32xf32>
    %213 = vector.extract_strided_slice %200 {offsets = [0, 64], sizes = [2, 32], strides = [1, 1]} : vector<2x128xf32> to vector<2x32xf32>
    %214 = math.tanh %213 : vector<2x32xf32>
    %215 = vector.extract_strided_slice %200 {offsets = [0, 96], sizes = [2, 32], strides = [1, 1]} : vector<2x128xf32> to vector<2x32xf32>
    %216 = arith.negf %215 : vector<2x32xf32>
    %217 = math.exp %216 : vector<2x32xf32>
    %cst_91 = arith.constant 1.000000e+00 : f32
    %218 = vector.broadcast %cst_91 : f32 to vector<2x32xf32>
    %219 = arith.addf %218, %217 : vector<2x32xf32>
    %220 = arith.divf %218, %219 : vector<2x32xf32>
    %221 = arith.mulf %212, %198 : vector<2x32xf32>
    %222 = arith.mulf %206, %214 : vector<2x32xf32>
    %223 = arith.addf %221, %222 : vector<2x32xf32>
    %224 = math.tanh %223 : vector<2x32xf32>
    %225 = arith.mulf %220, %224 : vector<2x32xf32>
    %c0_92 = arith.constant 0 : index
    %c0_93 = arith.constant 0 : index
    %226 = vector.load %arg6[%c0_92, %c0_93] : memref<2x32xf32, #tpu.memory_space<vmem>>, vector<2x32xf32>
    tpu.vector_store %arg6[%c0_92, %c0_93], %225 {strides = array<i32>} : memref<2x32xf32, #tpu.memory_space<vmem>>, vector<2x32xf32>,
    %c0_94 = arith.constant 0 : index
    %c0_95 = arith.constant 0 : index
    %227 = vector.load %arg7[%c0_94, %c0_95] : memref<2x32xf32, #tpu.memory_space<vmem>>, vector<2x32xf32>
    tpu.vector_store %arg7[%c0_94, %c0_95], %223 {strides = array<i32>} : memref<2x32xf32, #tpu.memory_space<vmem>>, vector<2x32xf32>,
    %228 = arith.index_cast %c5_i32 : i32 to index
    %c0_96 = arith.constant 0 : index
    %c0_97 = arith.constant 0 : index
    %229 = vector.load %arg8[%228, %c0_96, %c0_97] : memref<8x2x32xf32, #tpu.memory_space<vmem>>, vector<1x2x32xf32>
    %230 = vector.shape_cast %229 : vector<1x2x32xf32> to vector<2x32xf32>
    %231 = vector.shape_cast %225 : vector<2x32xf32> to vector<1x2x32xf32>
    tpu.vector_store %arg8[%228, %c0_96, %c0_97], %231 {strides = array<i32>} : memref<8x2x32xf32, #tpu.memory_space<vmem>>, vector<1x2x32xf32>,
    %c6_i32 = arith.constant 6 : i32
    %232 = arith.index_cast %c6_i32 : i32 to index
    %c0_98 = arith.constant 0 : index
    %c0_99 = arith.constant 0 : index
    %233 = vector.load %arg1[%232, %c0_98, %c0_99] : memref<8x2x128xf32, #tpu.memory_space<vmem>>, vector<1x2x128xf32>
    %234 = vector.shape_cast %233 : vector<1x2x128xf32> to vector<2x128xf32>
    %c0_100 = arith.constant 0 : index
    %c0_101 = arith.constant 0 : index
    %235 = vector.load %arg6[%c0_100, %c0_101] : memref<2x32xf32, #tpu.memory_space<vmem>>, vector<2x32xf32>
    %c0_102 = arith.constant 0 : index
    %c0_103 = arith.constant 0 : index
    %236 = vector.load %arg7[%c0_102, %c0_103] : memref<2x32xf32, #tpu.memory_space<vmem>>, vector<2x32xf32>
    %cst_104 = arith.constant dense<0.000000e+00> : vector<2x128xf32>
    %237 = tpu.matmul %235, %3, %cst_104 {dimension_numbers = #tpu.dot_dimension_numbers<[1], [0], [0], [1], [0, 0, 1, 1], [], []>} : vector<2x32xf32>, vector<32x128xf32>, vector<2x128xf32> -> vector<2x128xf32>
    %238 = arith.addf %234, %237 : vector<2x128xf32>
    %239 = vector.extract_strided_slice %238 {offsets = [0, 0], sizes = [2, 32], strides = [1, 1]} : vector<2x128xf32> to vector<2x32xf32>
    %240 = arith.negf %239 : vector<2x32xf32>
    %241 = math.exp %240 : vector<2x32xf32>
    %cst_105 = arith.constant 1.000000e+00 : f32
    %242 = vector.broadcast %cst_105 : f32 to vector<2x32xf32>
    %243 = arith.addf %242, %241 : vector<2x32xf32>
    %244 = arith.divf %242, %243 : vector<2x32xf32>
    %245 = vector.extract_strided_slice %238 {offsets = [0, 32], sizes = [2, 32], strides = [1, 1]} : vector<2x128xf32> to vector<2x32xf32>
    %246 = arith.negf %245 : vector<2x32xf32>
    %247 = math.exp %246 : vector<2x32xf32>
    %cst_106 = arith.constant 1.000000e+00 : f32
    %248 = vector.broadcast %cst_106 : f32 to vector<2x32xf32>
    %249 = arith.addf %248, %247 : vector<2x32xf32>
    %250 = arith.divf %248, %249 : vector<2x32xf32>
    %251 = vector.extract_strided_slice %238 {offsets = [0, 64], sizes = [2, 32], strides = [1, 1]} : vector<2x128xf32> to vector<2x32xf32>
    %252 = math.tanh %251 : vector<2x32xf32>
    %253 = vector.extract_strided_slice %238 {offsets = [0, 96], sizes = [2, 32], strides = [1, 1]} : vector<2x128xf32> to vector<2x32xf32>
    %254 = arith.negf %253 : vector<2x32xf32>
    %255 = math.exp %254 : vector<2x32xf32>
    %cst_107 = arith.constant 1.000000e+00 : f32
    %256 = vector.broadcast %cst_107 : f32 to vector<2x32xf32>
    %257 = arith.addf %256, %255 : vector<2x32xf32>
    %258 = arith.divf %256, %257 : vector<2x32xf32>
    %259 = arith.mulf %250, %236 : vector<2x32xf32>
    %260 = arith.mulf %244, %252 : vector<2x32xf32>
    %261 = arith.addf %259, %260 : vector<2x32xf32>
    %262 = math.tanh %261 : vector<2x32xf32>
    %263 = arith.mulf %258, %262 : vector<2x32xf32>
    %c0_108 = arith.constant 0 : index
    %c0_109 = arith.constant 0 : index
    %264 = vector.load %arg6[%c0_108, %c0_109] : memref<2x32xf32, #tpu.memory_space<vmem>>, vector<2x32xf32>
    tpu.vector_store %arg6[%c0_108, %c0_109], %263 {strides = array<i32>} : memref<2x32xf32, #tpu.memory_space<vmem>>, vector<2x32xf32>,
    %c0_110 = arith.constant 0 : index
    %c0_111 = arith.constant 0 : index
    %265 = vector.load %arg7[%c0_110, %c0_111] : memref<2x32xf32, #tpu.memory_space<vmem>>, vector<2x32xf32>
    tpu.vector_store %arg7[%c0_110, %c0_111], %261 {strides = array<i32>} : memref<2x32xf32, #tpu.memory_space<vmem>>, vector<2x32xf32>,
    %266 = arith.index_cast %c6_i32 : i32 to index
    %c0_112 = arith.constant 0 : index
    %c0_113 = arith.constant 0 : index
    %267 = vector.load %arg8[%266, %c0_112, %c0_113] : memref<8x2x32xf32, #tpu.memory_space<vmem>>, vector<1x2x32xf32>
    %268 = vector.shape_cast %267 : vector<1x2x32xf32> to vector<2x32xf32>
    %269 = vector.shape_cast %263 : vector<2x32xf32> to vector<1x2x32xf32>
    tpu.vector_store %arg8[%266, %c0_112, %c0_113], %269 {strides = array<i32>} : memref<8x2x32xf32, #tpu.memory_space<vmem>>, vector<1x2x32xf32>,
    %c7_i32 = arith.constant 7 : i32
    %270 = arith.index_cast %c7_i32 : i32 to index
    %c0_114 = arith.constant 0 : index
    %c0_115 = arith.constant 0 : index
    %271 = vector.load %arg1[%270, %c0_114, %c0_115] : memref<8x2x128xf32, #tpu.memory_space<vmem>>, vector<1x2x128xf32>
    %272 = vector.shape_cast %271 : vector<1x2x128xf32> to vector<2x128xf32>
    %c0_116 = arith.constant 0 : index
    %c0_117 = arith.constant 0 : index
    %273 = vector.load %arg6[%c0_116, %c0_117] : memref<2x32xf32, #tpu.memory_space<vmem>>, vector<2x32xf32>
    %c0_118 = arith.constant 0 : index
    %c0_119 = arith.constant 0 : index
    %274 = vector.load %arg7[%c0_118, %c0_119] : memref<2x32xf32, #tpu.memory_space<vmem>>, vector<2x32xf32>
    %cst_120 = arith.constant dense<0.000000e+00> : vector<2x128xf32>
    %275 = tpu.matmul %273, %3, %cst_120 {dimension_numbers = #tpu.dot_dimension_numbers<[1], [0], [0], [1], [0, 0, 1, 1], [], []>} : vector<2x32xf32>, vector<32x128xf32>, vector<2x128xf32> -> vector<2x128xf32>
    %276 = arith.addf %272, %275 : vector<2x128xf32>
    %277 = vector.extract_strided_slice %276 {offsets = [0, 0], sizes = [2, 32], strides = [1, 1]} : vector<2x128xf32> to vector<2x32xf32>
    %278 = arith.negf %277 : vector<2x32xf32>
    %279 = math.exp %278 : vector<2x32xf32>
    %cst_121 = arith.constant 1.000000e+00 : f32
    %280 = vector.broadcast %cst_121 : f32 to vector<2x32xf32>
    %281 = arith.addf %280, %279 : vector<2x32xf32>
    %282 = arith.divf %280, %281 : vector<2x32xf32>
    %283 = vector.extract_strided_slice %276 {offsets = [0, 32], sizes = [2, 32], strides = [1, 1]} : vector<2x128xf32> to vector<2x32xf32>
    %284 = arith.negf %283 : vector<2x32xf32>
    %285 = math.exp %284 : vector<2x32xf32>
    %cst_122 = arith.constant 1.000000e+00 : f32
    %286 = vector.broadcast %cst_122 : f32 to vector<2x32xf32>
    %287 = arith.addf %286, %285 : vector<2x32xf32>
    %288 = arith.divf %286, %287 : vector<2x32xf32>
    %289 = vector.extract_strided_slice %276 {offsets = [0, 64], sizes = [2, 32], strides = [1, 1]} : vector<2x128xf32> to vector<2x32xf32>
    %290 = math.tanh %289 : vector<2x32xf32>
    %291 = vector.extract_strided_slice %276 {offsets = [0, 96], sizes = [2, 32], strides = [1, 1]} : vector<2x128xf32> to vector<2x32xf32>
    %292 = arith.negf %291 : vector<2x32xf32>
    %293 = math.exp %292 : vector<2x32xf32>
    %cst_123 = arith.constant 1.000000e+00 : f32
    %294 = vector.broadcast %cst_123 : f32 to vector<2x32xf32>
    %295 = arith.addf %294, %293 : vector<2x32xf32>
    %296 = arith.divf %294, %295 : vector<2x32xf32>
    %297 = arith.mulf %288, %274 : vector<2x32xf32>
    %298 = arith.mulf %282, %290 : vector<2x32xf32>
    %299 = arith.addf %297, %298 : vector<2x32xf32>
    %300 = math.tanh %299 : vector<2x32xf32>
    %301 = arith.mulf %296, %300 : vector<2x32xf32>
    %c0_124 = arith.constant 0 : index
    %c0_125 = arith.constant 0 : index
    %302 = vector.load %arg6[%c0_124, %c0_125] : memref<2x32xf32, #tpu.memory_space<vmem>>, vector<2x32xf32>
    tpu.vector_store %arg6[%c0_124, %c0_125], %301 {strides = array<i32>} : memref<2x32xf32, #tpu.memory_space<vmem>>, vector<2x32xf32>,
    %c0_126 = arith.constant 0 : index
    %c0_127 = arith.constant 0 : index
    %303 = vector.load %arg7[%c0_126, %c0_127] : memref<2x32xf32, #tpu.memory_space<vmem>>, vector<2x32xf32>
    tpu.vector_store %arg7[%c0_126, %c0_127], %299 {strides = array<i32>} : memref<2x32xf32, #tpu.memory_space<vmem>>, vector<2x32xf32>,
    %304 = arith.index_cast %c7_i32 : i32 to index
    %c0_128 = arith.constant 0 : index
    %c0_129 = arith.constant 0 : index
    %305 = vector.load %arg8[%304, %c0_128, %c0_129] : memref<8x2x32xf32, #tpu.memory_space<vmem>>, vector<1x2x32xf32>
    %306 = vector.shape_cast %305 : vector<1x2x32xf32> to vector<2x32xf32>
    %307 = vector.shape_cast %301 : vector<2x32xf32> to vector<1x2x32xf32>
    tpu.vector_store %arg8[%304, %c0_128, %c0_129], %307 {strides = array<i32>} : memref<8x2x32xf32, #tpu.memory_space<vmem>>, vector<1x2x32xf32>,
    %c8_i32 = arith.constant 8 : i32
    %c0_130 = arith.constant 0 : index
    %c0_131 = arith.constant 0 : index
    %c0_132 = arith.constant 0 : index
    %308 = vector.load %arg8[%c0_130, %c0_131, %c0_132] : memref<8x2x32xf32, #tpu.memory_space<vmem>>, vector<8x2x32xf32>
    %309 = vector.shape_cast %308 : vector<8x2x32xf32> to vector<16x32xf32>
    %c0_133 = arith.constant 0 : index
    %c0_134 = arith.constant 0 : index
    %310 = vector.load %arg3[%c0_133, %c0_134] : memref<32x8xf32, #tpu.memory_space<vmem>>, vector<32x8xf32>
    %cst_135 = arith.constant dense<0.000000e+00> : vector<16x8xf32>
    %311 = tpu.matmul %309, %310, %cst_135 {dimension_numbers = #tpu.dot_dimension_numbers<[1], [0], [0], [1], [0, 0, 1, 1], [], []>} : vector<16x32xf32>, vector<32x8xf32>, vector<16x8xf32> -> vector<16x8xf32>
    %c0_136 = arith.constant 0 : index
    %c0_137 = arith.constant 0 : index
    %312 = vector.load %arg4[%c0_136, %c0_137] : memref<1x8xf32, #tpu.memory_space<vmem>>, vector<1x8xf32>
    %313 = vector.broadcast %312 : vector<1x8xf32> to vector<16x8xf32>
    %314 = arith.addf %311, %313 : vector<16x8xf32>
    %315 = vector.shape_cast %314 : vector<16x8xf32> to vector<8x2x8xf32>
    %c0_138 = arith.constant 0 : index
    %c0_139 = arith.constant 0 : index
    %c0_140 = arith.constant 0 : index
    %316 = vector.load %arg5[%c0_138, %c0_139, %c0_140] : memref<8x2x8xf32, #tpu.memory_space<vmem>>, vector<8x2x8xf32>
    tpu.vector_store %arg5[%c0_138, %c0_139, %c0_140], %315 {strides = array<i32>} : memref<8x2x8xf32, #tpu.memory_space<vmem>>, vector<8x2x8xf32>,
    return
  }
  func.func @transform_0(%arg0: i32) -> (i32, i32, i32) {
    %c0_i32 = arith.constant 0 : i32
    %c0_i32_0 = arith.constant 0 : i32
    %c0_i32_1 = arith.constant 0 : i32
    return %arg0, %c0_i32, %c0_i32_0 : i32, i32, i32
  }
  func.func @transform_1(%arg0: i32) -> (i32, i32) {
    %c0_i32 = arith.constant 0 : i32
    %c0_i32_0 = arith.constant 0 : i32
    %c0_i32_1 = arith.constant 0 : i32
    return %c0_i32, %c0_i32_0 : i32, i32
  }
  func.func @transform_2(%arg0: i32) -> (i32, i32) {
    %c0_i32 = arith.constant 0 : i32
    %c0_i32_0 = arith.constant 0 : i32
    %c0_i32_1 = arith.constant 0 : i32
    return %c0_i32, %c0_i32_0 : i32, i32
  }
  func.func @transform_3(%arg0: i32) -> (i32, i32) {
    %c0_i32 = arith.constant 0 : i32
    %c0_i32_0 = arith.constant 0 : i32
    %c0_i32_1 = arith.constant 0 : i32
    return %c0_i32, %c0_i32_0 : i32, i32
  }
  func.func @transform_4(%arg0: i32) -> (i32, i32, i32) {
    %c0_i32 = arith.constant 0 : i32
    %c0_i32_0 = arith.constant 0 : i32
    %c0_i32_1 = arith.constant 0 : i32
    return %arg0, %c0_i32, %c0_i32_0 : i32, i32, i32
  }
}

</mosaic_0001>

<bundles_post_ra>
// kernel: tlstm_forward.6
= control target key start
LH: loop header
LB: loop body
LE: loop exit
PB: predicated region body
PF: predicated region fallthrough
CT: control target
= control target key end

     0   :  { %vm27_vm0 = vcmask 261120   ;;  %s190_s1 = inlined_call_operand.vmem [shape: f32[32,128], index: 1, kind: input, shape index: {}]   ;;  %s191_s0 = inlined_call_operand.vmem [shape: f32[16,32], index: 0, kind: input, shape index: {}]   ;;  %s192_s2 = inlined_call_operand.vmem [shape: f32[1,128], index: 2, kind: input, shape index: {}]   ;;  %s193_s3 = inlined_call_operand.vmem [shape: f32[16,128], index: 3, kind: output, shape index: {}]  }
   0x1   :  { %v16_v0 = vld [vmem:[%s190_s1] sm:$0xff]  ;;  %v17_v1 = vld [vmem:[%s190_s1 + $0x8] sm:$0xff]  ;;  %v18_v2 = vld [vmem:[%s190_s1 + $0x10] sm:$0xff] }
   0x2   :  { %v135_v3 = vpack.c.bf16 %v17_v1, %v16_v0  ;;  %v19_v4 = vld [vmem:[%s190_s1 + $0x18] sm:$0xff]  ;;  %v14_v5 = vld [vmem:[%s191_s0] sm:$0xff]  ;;  %v15_v7 = vld [vmem:[%s191_s0 + $0x8] sm:$0xff] }
   0x3   :  { %v139_v6 = vpack.c.bf16 %v19_v4, %v18_v2  ;;  %132 = vmatprep.mubr.msk.f32.mxu0 %vm27_vm0, %v14_v5  ;;  %v115_v8 = vld [vmem:[%s192_s2] ss:$0 sm:$0xff] }
   0x4   :  { %136 = vmatprep.subr.bf16.mxu0 %v135_v3 }
   0x5   :  { %138 = vmatpush3.bf16.msra.mxu0 %v135_v3 }
   0x6   :  { %140 = vmatprep.subr.bf16.mxu0 %v139_v6 }
   0x9   :  { %142 = vmatpush3.bf16.msra.mxu0 %v139_v6 }
   0xc   :  { %133 = vmatmul.mubr.msk.f32.vlgmr.msra.gmra.mrb[0].mxu0 %vm27_vm0, %v15_v7 }
  0xdf   :  { %v134_v9 = vpop.f32.mrb[0].mxu0 }
  0xe0   :  { %v106_v10 = vadd.f32 %v134_v9, %v115_v8  ;;  %v100_v11 = vpop.f32.mrb[1].mxu0 }
  0xe1   :  { %v101_v12 = vadd.f32 %v115_v8, %v100_v11 }
  0xe2   :  { %110 = vst [vmem:[%s193_s3 + $0x8] sm:$0xff] %v106_v10 }
  0xe3   :  { %109 = vst [vmem:[%s193_s3] sm:$0xff] %v101_v12 }

// kernel: tlstm_forward.4
= control target key start
LH: loop header
LB: loop body
LE: loop exit
PB: predicated region body
PF: predicated region fallthrough
CT: control target
= control target key end

     0   :  { %vm25_vm0 = vcmask 130048   ;;  %s172_s1 = inlined_call_operand.vmem [shape: f32[16,128], index: 1, kind: input, shape index: {}]   ;;  %s173_s0 = inlined_call_operand.vmem [shape: f32[16,16], index: 0, kind: input, shape index: {}]   ;;  %s174_s2 = inlined_call_operand.vmem [shape: f32[1,128], index: 2, kind: input, shape index: {}]   ;;  %s175_s3 = inlined_call_operand.vmem [shape: f32[16,128], index: 3, kind: output, shape index: {}]  }
   0x1   :  { %v16_v0 = vld [vmem:[%s172_s1] sm:$0xff]  ;;  %v17_v1 = vld [vmem:[%s172_s1 + $0x8] sm:$0xff] }
   0x2   :  { %v14_v2 = vld [vmem:[%s173_s0] sm:$0xff]  ;;  %v127_v3 = vpack.c.bf16 %v17_v1, %v16_v0  ;;  %v15_v4 = vld [vmem:[%s173_s0 + $0x8] sm:$0xff] }
   0x3   :  { %124 = vmatprep.mubr.msk.f32.mxu0 %vm25_vm0, %v14_v2  ;;  %v113_v5 = vld [vmem:[%s174_s2] ss:$0 sm:$0xff] }
   0x4   :  { %128 = vmatprep.subr.bf16.mxu0 %v127_v3 }
   0x5   :  { %130 = vmatpush3.bf16.msra.mxu0 %v127_v3 }
   0x8   :  { %125 = vmatmul.mubr.msk.f32.vlgmr.msra.gmra.mrb[0].mxu0 %vm25_vm0, %v15_v4 }
  0xdb   :  { %v126_v6 = vpop.f32.mrb[0].mxu0 }
  0xdc   :  { %v104_v7 = vadd.f32 %v126_v6, %v113_v5  ;;  %v98_v8 = vpop.f32.mrb[1].mxu0 }
  0xdd   :  { %v99_v9 = vadd.f32 %v113_v5, %v98_v8 }
  0xde   :  { %108 = vst [vmem:[%s175_s3 + $0x8] sm:$0xff] %v104_v7 }
  0xdf   :  { %107 = vst [vmem:[%s175_s3] sm:$0xff] %v99_v9 }

// kernel: tlstm_forward.5
= control target key start
LH: loop header
LB: loop body
LE: loop exit
PB: predicated region body
PF: predicated region fallthrough
CT: control target
= control target key end

     0   :  { %vm15_vm0 = vcmask 254976   ;;  %v1246_v0 = vmov 0.0|0.0   ;;  %v1247_v4 = vmov 0.0   ;;  %vm1248_vm1 = vmmov 0   ;;  %s1249_s18 = smov 64   ;;  %s1250_s19 = smov 32   ;;  %s1463_s1 = inlined_call_operand.vmem [shape: f32[32,128], index: 1, kind: input, shape index: {}]   ;;  %s1464_s0 = inlined_call_operand.vmem [shape: f32[8,2,128], index: 0, kind: input, shape index: {}]   ;;  %s1465_s2 = inlined_call_operand.vmem [shape: f32[8,2,32], index: 2, kind: output, shape index: {}]  }
   0x1   :  { %1128 = vmatprep.subr.bf16.mxu0 %v1246_v0  ;;  %v18_v1 = vld [vmem:[%s1463_s1] sm:$0xff]  ;;  %v19_v2 = vld [vmem:[%s1463_s1 + $0x8] sm:$0xff]  ;;  %v20_v3 = vld [vmem:[%s1463_s1 + $0x10] sm:$0xff]  ;;  %16 = vst.msk [vmem:[#allocation2] sm:$0x3] %vm15_vm0, %v1247_v4  ;;  %1048 = vmatprep.mubr.msk.f32.mxu0 %vm1248_vm1, %v1247_v4  ;;  %vm25_vm2 = vcmask 261120  }
   0x2   :  { %17 = vst.msk [vmem:[#allocation3] sm:$0x3] %vm15_vm0, %v1247_v4  ;;  %v1283_v5 = vpack.c.bf16 %v19_v2, %v18_v1  ;;  %v21_v6 = vld [vmem:[%s1463_s1 + $0x18] sm:$0xff]  ;;  %1134 = vmatprep.subr.bf16.mxu1 %v1246_v0  ;;  %1059 = vmatprep.mubr.msk.f32.mxu1 %vm1248_vm1, %v1247_v4  ;;  %v22_v9 = vld [vmem:[%s1464_s0] sm:$0x3]  ;;  %s1251_s20 = smov 96  }
   0x3   :  { %v1292_v7 = vpack.c.bf16 %v21_v6, %v20_v3  ;;  %v972_v32 = vld [vmem:[%s1464_s0 + $0x2] sm:$0x3]  ;;  %v976_v54 = vld [vmem:[%s1464_s0 + $0x4] sm:$0x3] }
   0x4   :  { %1130 = vmatpush3.bf16.msra.mxu0 %v1283_v5  ;;  %1136 = vmatpush3.bf16.msra.mxu1 %v1283_v5 }
   0x5   :  { %1131 = vmatprep.subr.bf16.mxu0 %v1246_v0  ;;  %1137 = vmatprep.subr.bf16.mxu1 %v1246_v0 }
   0x8   :  { %1133 = vmatpush3.bf16.msra.mxu0 %v1292_v7  ;;  %v23_v8 = vld [vmem:[#allocation2] sm:$0x3]  ;;  %1139 = vmatpush3.bf16.msra.mxu1 %v1292_v7 }
   0x9   :  { %1140 = vmatprep.subr.bf16.mxu0 %v1246_v0  ;;  %1146 = vmatprep.subr.bf16.mxu1 %v1246_v0  ;;  %v24_v14 = vld [vmem:[#allocation3] sm:$0x3] }
   0xb   :  { %1049 = vmatmul.mubr.msk.f32.vlgmr.msra.gmra.mrb[0].mxu0 %vm25_vm2, %v23_v8 }
   0xc   :  { %1142 = vmatpush3.bf16.msra.mxu0 %v1283_v5  ;;  %1070 = vmatprep.mubr.msk.f32.mxu0 %vm1248_vm1, %v1247_v4 }
   0xd   :  { %1143 = vmatprep.subr.bf16.mxu0 %v1246_v0 }
  0x10   :  { %1145 = vmatpush3.bf16.msra.mxu0 %v1292_v7 }
  0x11   :  { %1152 = vmatprep.subr.bf16.mxu0 %v1246_v0 }
  0xde   :  { %v95_v10 = vpop.f32.mrb[0].mxu0 }
  0xdf   :  { %v99_v11 = vadd.f32 %v95_v10, %v22_v9  ;;  %v1050_v12 = vpop.f32.mrb[1].mxu0 }
  0xe1   :  { %1182 = vtanh.f32 %v99_v11  ;;  %v971_v15 = vmul.f32 -1.442695, %v99_v11 }
  0xe3   :  { %1184 = vpow2.f32 %v971_v15 }
  0xeb   :  { %v1183_v13 = vpop.eup %1182 }
  0xec   :  { %113 = vrot.lane.b32.xlu0 %v1183_v13, %s1249_s18 }
  0xed   :  { %v1185_v16 = vpop.eup %1184 }
  0xee   :  { %v103_v17 = vadd.f32 1.0, %v1185_v16  ;;  %v980_v16 = vld [vmem:[%s1464_s0 + $0x6] sm:$0x3] }
  0xf0   :  { %108 = vrot.lane.b32.xlu0 %v24_v14, %s1250_s19  ;;  %1186 = vrcp.f32 %v103_v17 }
  0xfa   :  { %v1187_v18 = vpop.eup %1186 }
 0x15e   :  { %v114_v19 = vpop.permute.xlu0 %113 }
 0x15f   :  { %v116_v20 = vmul.f32 %v1187_v18, %v114_v19 }
 0x161   :  { %118 = vrot.lane.b32.xlu1 %v116_v20, %s1250_s19 }
 0x162   :  { %v109_v21 = vpop.permute.xlu0 %108 }
 0x163   :  { %v111_v22 = vmul.f32 %v1187_v18, %v109_v21 }
 0x1d3   :  { %v119_v23 = vpop.permute.xlu1 %118 }
 0x1d4   :  { %v121_v24 = vadd.f32 %v119_v23, %v111_v22 }
 0x1d6   :  { %1188 = vtanh.f32 %v121_v24 }
 0x1e0   :  { %v1189_v25 = vpop.eup %1188 }
 0x1e1   :  { %124 = vrot.lane.b32.xlu1 %v1189_v25, %s1249_s18 }
 0x1e5   :  { %135 = vrot.lane.b32.xlu1 %v121_v24, %s1251_s20 }
 0x253   :  { %v125_v26 = vpop.permute.xlu1 %124 }
 0x254   :  { %v127_v27 = vmul.f32 %v1187_v18, %v125_v26 }
 0x256   :  { %129 = vrot.lane.b32.xlu0 %v127_v27, %s1250_s19 }
 0x257   :  { %v136_v28 = vpop.permute.xlu1 %135 }
 0x258   :  { %138 = vst.msk [vmem:[#allocation3] sm:$0x3] %vm15_vm0, %v136_v28 }
 0x25f   :  { %v143_v29 = vld [vmem:[#allocation3] sm:$0x3] }
 0x260   :  { %226 = vrot.lane.b32.xlu1 %v143_v29, %s1250_s19 }
 0x2c8   :  { %v130_v30 = vpop.permute.xlu0 %129 }
 0x2c9   :  { %133 = vst.msk [vmem:[#allocation2] sm:$0x3] %vm15_vm0, %v130_v30  ;;  %139 = vst.msk [vmem:[%s1465_s2] sm:$0x3] %vm15_vm0, %v130_v30 }
 0x2d0   :  { %v142_v31 = vld [vmem:[#allocation2] sm:$0x3] }
 0x2d1   :  { %1060 = vmatmul.mubr.msk.f32.vlgmr.msra.gmra.mrb[0].mxu1 %vm25_vm2, %v142_v31 }
 0x2d2   :  { %1148 = vmatpush3.bf16.msra.mxu1 %v1283_v5  ;;  %1081 = vmatprep.mubr.msk.f32.mxu1 %vm1248_vm1, %v1247_v4  ;;  %v227_v43 = vpop.permute.xlu1 %226 }
 0x2d3   :  { %1149 = vmatprep.subr.bf16.mxu1 %v1246_v0 }
 0x2d6   :  { %1151 = vmatpush3.bf16.msra.mxu1 %v1292_v7 }
 0x2d7   :  { %1158 = vmatprep.subr.bf16.mxu1 %v1246_v0 }
 0x3a4   :  { %v213_v33 = vpop.f32.mrb[0].mxu1 }
 0x3a5   :  { %v217_v34 = vadd.f32 %v972_v32, %v213_v33  ;;  %v1061_v35 = vpop.f32.mrb[1].mxu1 }
 0x3a7   :  { %1190 = vtanh.f32 %v217_v34  ;;  %v974_v37 = vmul.f32 -1.442695, %v217_v34 }
 0x3a9   :  { %1192 = vpow2.f32 %v974_v37 }
 0x3b1   :  { %v1191_v36 = vpop.eup %1190 }
 0x3b2   :  { %231 = vrot.lane.b32.xlu0 %v1191_v36, %s1249_s18 }
 0x3b3   :  { %v1193_v38 = vpop.eup %1192 }
 0x3b4   :  { %v221_v39 = vadd.f32 1.0, %v1193_v38  ;;  %v984_v38 = vld [vmem:[%s1464_s0 + $0x8] sm:$0x3] }
 0x3b6   :  { %1194 = vrcp.f32 %v221_v39 }
 0x3c0   :  { %v1195_v40 = vpop.eup %1194 }
 0x3c1   :  { %v229_v44 = vmul.f32 %v1195_v40, %v227_v43 }
 0x424   :  { %v232_v41 = vpop.permute.xlu0 %231 }
 0x425   :  { %v234_v42 = vmul.f32 %v1195_v40, %v232_v41 }
 0x427   :  { %236 = vrot.lane.b32.xlu0 %v234_v42, %s1250_s19 }
 0x499   :  { %v237_v45 = vpop.permute.xlu0 %236 }
 0x49a   :  { %v239_v46 = vadd.f32 %v237_v45, %v229_v44 }
 0x49c   :  { %1196 = vtanh.f32 %v239_v46 }
 0x4a6   :  { %v1197_v47 = vpop.eup %1196 }
 0x4a7   :  { %242 = vrot.lane.b32.xlu1 %v1197_v47, %s1249_s18 }
 0x4ab   :  { %252 = vrot.lane.b32.xlu1 %v239_v46, %s1251_s20 }
 0x519   :  { %v243_v48 = vpop.permute.xlu1 %242 }
 0x51a   :  { %v245_v49 = vmul.f32 %v1195_v40, %v243_v48 }
 0x51c   :  { %247 = vrot.lane.b32.xlu0 %v245_v49, %s1250_s19 }
 0x51d   :  { %v253_v50 = vpop.permute.xlu1 %252 }
 0x51e   :  { %255 = vst.msk [vmem:[#allocation3] sm:$0x3] %vm15_vm0, %v253_v50 }
 0x525   :  { %v261_v51 = vld [vmem:[#allocation3] sm:$0x3] }
 0x526   :  { %344 = vrot.lane.b32.xlu1 %v261_v51, %s1250_s19 }
 0x58e   :  { %v248_v52 = vpop.permute.xlu0 %247 }
 0x58f   :  { %250 = vst.msk [vmem:[#allocation2] sm:$0x3] %vm15_vm0, %v248_v52  ;;  %975 = vst.msk [vmem:[%s1465_s2 + $0x2] sm:$0x3] %vm15_vm0, %v248_v52 }
 0x596   :  { %v260_v53 = vld [vmem:[#allocation2] sm:$0x3] }
 0x597   :  { %1071 = vmatmul.mubr.msk.f32.vlgmr.msra.gmra.mrb[2].mxu0 %vm25_vm2, %v260_v53 }
 0x598   :  { %1154 = vmatpush3.bf16.msra.mxu0 %v1283_v5  ;;  %1092 = vmatprep.mubr.msk.f32.mxu0 %vm1248_vm1, %v1247_v4  ;;  %v345_v2 = vpop.permute.xlu1 %344 }
 0x599   :  { %1155 = vmatprep.subr.bf16.mxu0 %v1246_v0 }
 0x59c   :  { %1157 = vmatpush3.bf16.msra.mxu0 %v1292_v7 }
 0x59d   :  { %1164 = vmatprep.subr.bf16.mxu0 %v1246_v0 }
 0x66a   :  { %v331_v55 = vpop.f32.mrb[2].mxu0 }
 0x66b   :  { %v335_v56 = vadd.f32 %v976_v54, %v331_v55  ;;  %v1072_v57 = vpop.f32.mrb[3].mxu0 }
 0x66d   :  { %1198 = vtanh.f32 %v335_v56  ;;  %v978_v59 = vmul.f32 -1.442695, %v335_v56 }
 0x66f   :  { %1200 = vpow2.f32 %v978_v59 }
 0x677   :  { %v1199_v58 = vpop.eup %1198 }
 0x678   :  { %349 = vrot.lane.b32.xlu0 %v1199_v58, %s1249_s18 }
 0x679   :  { %v1201_v60 = vpop.eup %1200 }
 0x67a   :  { %v339_v61 = vadd.f32 1.0, %v1201_v60  ;;  %v988_v60 = vld [vmem:[%s1464_s0 + $0xa] sm:$0x3] }
 0x67c   :  { %1202 = vrcp.f32 %v339_v61 }
 0x686   :  { %v1203_v62 = vpop.eup %1202 }
 0x687   :  { %v347_v3 = vmul.f32 %v1203_v62, %v345_v2 }
 0x6ea   :  { %v350_v63 = vpop.permute.xlu0 %349 }
 0x6eb   :  { %v352_v1 = vmul.f32 %v1203_v62, %v350_v63 }
 0x6ed   :  { %354 = vrot.lane.b32.xlu0 %v352_v1, %s1250_s19 }
 0x75f   :  { %v355_v6 = vpop.permute.xlu0 %354 }
 0x760   :  { %v357_v8 = vadd.f32 %v355_v6, %v347_v3 }
 0x762   :  { %1204 = vtanh.f32 %v357_v8 }
 0x76c   :  { %v1205_v9 = vpop.eup %1204 }
 0x76d   :  { %360 = vrot.lane.b32.xlu1 %v1205_v9, %s1249_s18 }
 0x771   :  { %370 = vrot.lane.b32.xlu1 %v357_v8, %s1251_s20 }
 0x7df   :  { %v361_v10 = vpop.permute.xlu1 %360 }
 0x7e0   :  { %v363_v11 = vmul.f32 %v1203_v62, %v361_v10 }
 0x7e2   :  { %365 = vrot.lane.b32.xlu0 %v363_v11, %s1250_s19 }
 0x7e3   :  { %v371_v12 = vpop.permute.xlu1 %370 }
 0x7e4   :  { %373 = vst.msk [vmem:[#allocation3] sm:$0x3] %vm15_vm0, %v371_v12 }
 0x7eb   :  { %v379_v13 = vld [vmem:[#allocation3] sm:$0x3] }
 0x7ec   :  { %462 = vrot.lane.b32.xlu1 %v379_v13, %s1250_s19 }
 0x854   :  { %v366_v14 = vpop.permute.xlu0 %365 }
 0x855   :  { %368 = vst.msk [vmem:[#allocation2] sm:$0x3] %vm15_vm0, %v366_v14  ;;  %979 = vst.msk [vmem:[%s1465_s2 + $0x4] sm:$0x3] %vm15_vm0, %v366_v14 }
 0x85c   :  { %v378_v15 = vld [vmem:[#allocation2] sm:$0x3] }
 0x85d   :  { %1082 = vmatmul.mubr.msk.f32.vlgmr.msra.gmra.mrb[2].mxu1 %vm25_vm2, %v378_v15 }
 0x85e   :  { %1160 = vmatpush3.bf16.msra.mxu1 %v1283_v5  ;;  %1103 = vmatprep.mubr.msk.f32.mxu1 %vm1248_vm1, %v1247_v4  ;;  %v463_v27 = vpop.permute.xlu1 %462 }
 0x85f   :  { %1161 = vmatprep.subr.bf16.mxu1 %v1246_v0 }
 0x862   :  { %1163 = vmatpush3.bf16.msra.mxu1 %v1292_v7 }
 0x863   :  { %1170 = vmatprep.subr.bf16.mxu1 %v1246_v0 }
 0x930   :  { %v449_v17 = vpop.f32.mrb[2].mxu1 }
 0x931   :  { %v453_v18 = vadd.f32 %v980_v16, %v449_v17  ;;  %v1083_v19 = vpop.f32.mrb[3].mxu1 }
 0x933   :  { %1206 = vtanh.f32 %v453_v18  ;;  %v982_v21 = vmul.f32 -1.442695, %v453_v18  ;;  %v992_v18 = vld [vmem:[%s1464_s0 + $0xc] sm:$0x3] }
 0x935   :  { %1208 = vpow2.f32 %v982_v21 }
 0x93d   :  { %v1207_v20 = vpop.eup %1206 }
 0x93e   :  { %467 = vrot.lane.b32.xlu0 %v1207_v20, %s1249_s18 }
 0x93f   :  { %v1209_v22 = vpop.eup %1208 }
 0x940   :  { %v457_v23 = vadd.f32 1.0, %v1209_v22 }
 0x942   :  { %1210 = vrcp.f32 %v457_v23 }
 0x94c   :  { %v1211_v24 = vpop.eup %1210 }
 0x94d   :  { %v465_v28 = vmul.f32 %v1211_v24, %v463_v27 }
 0x9b0   :  { %v468_v25 = vpop.permute.xlu0 %467 }
 0x9b1   :  { %v470_v26 = vmul.f32 %v1211_v24, %v468_v25 }
 0x9b3   :  { %472 = vrot.lane.b32.xlu0 %v470_v26, %s1250_s19 }
 0xa25   :  { %v473_v29 = vpop.permute.xlu0 %472 }
 0xa26   :  { %v475_v30 = vadd.f32 %v473_v29, %v465_v28 }
 0xa28   :  { %1212 = vtanh.f32 %v475_v30 }
 0xa32   :  { %v1213_v31 = vpop.eup %1212 }
 0xa33   :  { %478 = vrot.lane.b32.xlu1 %v1213_v31, %s1249_s18 }
 0xa37   :  { %488 = vrot.lane.b32.xlu1 %v475_v30, %s1251_s20 }
 0xaa5   :  { %v479_v32 = vpop.permute.xlu1 %478 }
 0xaa6   :  { %v481_v33 = vmul.f32 %v1211_v24, %v479_v32 }
 0xaa8   :  { %483 = vrot.lane.b32.xlu0 %v481_v33, %s1250_s19 }
 0xaa9   :  { %v489_v34 = vpop.permute.xlu1 %488 }
 0xaaa   :  { %491 = vst.msk [vmem:[#allocation3] sm:$0x3] %vm15_vm0, %v489_v34 }
 0xab1   :  { %v497_v35 = vld [vmem:[#allocation3] sm:$0x3] }
 0xab2   :  { %580 = vrot.lane.b32.xlu1 %v497_v35, %s1250_s19 }
 0xb1a   :  { %v484_v36 = vpop.permute.xlu0 %483 }
 0xb1b   :  { %486 = vst.msk [vmem:[#allocation2] sm:$0x3] %vm15_vm0, %v484_v36  ;;  %983 = vst.msk [vmem:[%s1465_s2 + $0x6] sm:$0x3] %vm15_vm0, %v484_v36 }
 0xb22   :  { %v496_v37 = vld [vmem:[#allocation2] sm:$0x3] }
 0xb23   :  { %1093 = vmatmul.mubr.msk.f32.vlgmr.msra.gmra.mrb[4].mxu0 %vm25_vm2, %v496_v37 }
 0xb24   :  { %1166 = vmatpush3.bf16.msra.mxu0 %v1283_v5  ;;  %1114 = vmatprep.mubr.msk.f32.mxu0 %vm1248_vm1, %v1247_v4  ;;  %v581_v49 = vpop.permute.xlu1 %580 }
 0xb25   :  { %1167 = vmatprep.subr.bf16.mxu0 %v1246_v0 }
 0xb28   :  { %1169 = vmatpush3.bf16.msra.mxu0 %v1292_v7 }
 0xbf6   :  { %v567_v39 = vpop.f32.mrb[4].mxu0 }
 0xbf7   :  { %v571_v40 = vadd.f32 %v984_v38, %v567_v39  ;;  %v1094_v41 = vpop.f32.mrb[5].mxu0 }
 0xbf9   :  { %1214 = vtanh.f32 %v571_v40  ;;  %v986_v43 = vmul.f32 -1.442695, %v571_v40  ;;  %v996_v40 = vld [vmem:[%s1464_s0 + $0xe] sm:$0x3] }
 0xbfb   :  { %1216 = vpow2.f32 %v986_v43 }
 0xc03   :  { %v1215_v42 = vpop.eup %1214 }
 0xc04   :  { %585 = vrot.lane.b32.xlu0 %v1215_v42, %s1249_s18 }
 0xc05   :  { %v1217_v44 = vpop.eup %1216 }
 0xc06   :  { %v575_v45 = vadd.f32 1.0, %v1217_v44 }
 0xc08   :  { %1218 = vrcp.f32 %v575_v45 }
 0xc12   :  { %v1219_v46 = vpop.eup %1218 }
 0xc13   :  { %v583_v50 = vmul.f32 %v1219_v46, %v581_v49 }
 0xc76   :  { %v586_v47 = vpop.permute.xlu0 %585 }
 0xc77   :  { %v588_v48 = vmul.f32 %v1219_v46, %v586_v47 }
 0xc79   :  { %590 = vrot.lane.b32.xlu0 %v588_v48, %s1250_s19 }
 0xceb   :  { %v591_v51 = vpop.permute.xlu0 %590 }
 0xcec   :  { %v593_v52 = vadd.f32 %v591_v51, %v583_v50 }
 0xcee   :  { %1220 = vtanh.f32 %v593_v52 }
 0xcf8   :  { %v1221_v53 = vpop.eup %1220 }
 0xcf9   :  { %596 = vrot.lane.b32.xlu1 %v1221_v53, %s1249_s18 }
 0xcfd   :  { %606 = vrot.lane.b32.xlu1 %v593_v52, %s1251_s20 }
 0xd6b   :  { %v597_v54 = vpop.permute.xlu1 %596 }
 0xd6c   :  { %v599_v55 = vmul.f32 %v1219_v46, %v597_v54 }
 0xd6e   :  { %601 = vrot.lane.b32.xlu0 %v599_v55, %s1250_s19 }
 0xd6f   :  { %v607_v56 = vpop.permute.xlu1 %606 }
 0xd70   :  { %609 = vst.msk [vmem:[#allocation3] sm:$0x3] %vm15_vm0, %v607_v56 }
 0xd77   :  { %v615_v57 = vld [vmem:[#allocation3] sm:$0x3] }
 0xd78   :  { %698 = vrot.lane.b32.xlu1 %v615_v57, %s1250_s19 }
 0xde0   :  { %v602_v58 = vpop.permute.xlu0 %601 }
 0xde1   :  { %604 = vst.msk [vmem:[#allocation2] sm:$0x3] %vm15_vm0, %v602_v58  ;;  %987 = vst.msk [vmem:[%s1465_s2 + $0x8] sm:$0x3] %vm15_vm0, %v602_v58 }
 0xde8   :  { %v614_v59 = vld [vmem:[#allocation2] sm:$0x3] }
 0xde9   :  { %1104 = vmatmul.mubr.msk.f32.vlgmr.msra.gmra.mrb[4].mxu1 %vm25_vm2, %v614_v59 }
 0xdea   :  { %1172 = vmatpush3.bf16.msra.mxu1 %v1283_v5  ;;  %1125 = vmatprep.mubr.msk.f32.mxu1 %vm1248_vm1, %v1247_v4 }
 0xdeb   :  { %1173 = vmatprep.subr.bf16.mxu1 %v1246_v0 }
 0xdee   :  { %1175 = vmatpush3.bf16.msra.mxu1 %v1292_v7  ;;  %v699_v7 = vpop.permute.xlu1 %698 }
 0xebc   :  { %v685_v61 = vpop.f32.mrb[4].mxu1 }
 0xebd   :  { %v689_v62 = vadd.f32 %v988_v60, %v685_v61  ;;  %v1105_v63 = vpop.f32.mrb[5].mxu1 }
 0xebf   :  { %1222 = vtanh.f32 %v689_v62  ;;  %v990_v2 = vmul.f32 -1.442695, %v689_v62 }
 0xec1   :  { %1224 = vpow2.f32 %v990_v2 }
 0xec9   :  { %v1223_v1 = vpop.eup %1222 }
 0xeca   :  { %703 = vrot.lane.b32.xlu0 %v1223_v1, %s1249_s18 }
 0xecb   :  { %v1225_v5 = vpop.eup %1224 }
 0xecc   :  { %v693_v3 = vadd.f32 1.0, %v1225_v5 }
 0xece   :  { %1226 = vrcp.f32 %v693_v3 }
 0xed8   :  { %v1227_v4 = vpop.eup %1226 }
 0xed9   :  { %v701_v8 = vmul.f32 %v1227_v4, %v699_v7 }
 0xf3c   :  { %v704_v0 = vpop.permute.xlu0 %703 }
 0xf3d   :  { %v706_v6 = vmul.f32 %v1227_v4, %v704_v0 }
 0xf3f   :  { %708 = vrot.lane.b32.xlu0 %v706_v6, %s1250_s19 }
 0xfb1   :  { %v709_v9 = vpop.permute.xlu0 %708 }
 0xfb2   :  { %v711_v10 = vadd.f32 %v709_v9, %v701_v8 }
 0xfb4   :  { %1228 = vtanh.f32 %v711_v10 }
 0xfbe   :  { %v1229_v11 = vpop.eup %1228 }
 0xfbf   :  { %714 = vrot.lane.b32.xlu1 %v1229_v11, %s1249_s18 }
 0xfc3   :  { %724 = vrot.lane.b32.xlu1 %v711_v10, %s1251_s20 }
0x1031   :  { %v715_v12 = vpop.permute.xlu1 %714 }
0x1032   :  { %v717_v13 = vmul.f32 %v1227_v4, %v715_v12 }
0x1034   :  { %719 = vrot.lane.b32.xlu0 %v717_v13, %s1250_s19 }
0x1035   :  { %v725_v14 = vpop.permute.xlu1 %724 }
0x1036   :  { %727 = vst.msk [vmem:[#allocation3] sm:$0x3] %vm15_vm0, %v725_v14 }
0x103d   :  { %v733_v15 = vld [vmem:[#allocation3] sm:$0x3] }
0x103e   :  { %816 = vrot.lane.b32.xlu1 %v733_v15, %s1250_s19 }
0x10a6   :  { %v720_v16 = vpop.permute.xlu0 %719 }
0x10a7   :  { %722 = vst.msk [vmem:[#allocation2] sm:$0x3] %vm15_vm0, %v720_v16  ;;  %991 = vst.msk [vmem:[%s1465_s2 + $0xa] sm:$0x3] %vm15_vm0, %v720_v16 }
0x10ae   :  { %v732_v17 = vld [vmem:[#allocation2] sm:$0x3] }
0x10af   :  { %1115 = vmatmul.mubr.msk.f32.vlgmr.msra.gmra.mrb[6].mxu0 %vm25_vm2, %v732_v17 }
0x10b0   :  { %v817_v29 = vpop.permute.xlu1 %816 }
0x1182   :  { %v803_v19 = vpop.f32.mrb[6].mxu0 }
0x1183   :  { %v807_v20 = vadd.f32 %v992_v18, %v803_v19  ;;  %v1116_v21 = vpop.f32.mrb[7].mxu0 }
0x1185   :  { %1230 = vtanh.f32 %v807_v20  ;;  %v994_v23 = vmul.f32 -1.442695, %v807_v20 }
0x1187   :  { %1232 = vpow2.f32 %v994_v23 }
0x118f   :  { %v1231_v22 = vpop.eup %1230 }
0x1190   :  { %821 = vrot.lane.b32.xlu0 %v1231_v22, %s1249_s18 }
0x1191   :  { %v1233_v24 = vpop.eup %1232 }
0x1192   :  { %v811_v25 = vadd.f32 1.0, %v1233_v24 }
0x1194   :  { %1234 = vrcp.f32 %v811_v25 }
0x119e   :  { %v1235_v26 = vpop.eup %1234 }
0x119f   :  { %v819_v30 = vmul.f32 %v1235_v26, %v817_v29 }
0x1202   :  { %v822_v27 = vpop.permute.xlu0 %821 }
0x1203   :  { %v824_v28 = vmul.f32 %v1235_v26, %v822_v27 }
0x1205   :  { %826 = vrot.lane.b32.xlu0 %v824_v28, %s1250_s19 }
0x1277   :  { %v827_v31 = vpop.permute.xlu0 %826 }
0x1278   :  { %v829_v32 = vadd.f32 %v827_v31, %v819_v30 }
0x127a   :  { %1236 = vtanh.f32 %v829_v32 }
0x1284   :  { %v1237_v33 = vpop.eup %1236 }
0x1285   :  { %832 = vrot.lane.b32.xlu1 %v1237_v33, %s1249_s18 }
0x1289   :  { %842 = vrot.lane.b32.xlu1 %v829_v32, %s1251_s20 }
0x12f7   :  { %v833_v34 = vpop.permute.xlu1 %832 }
0x12f8   :  { %v835_v35 = vmul.f32 %v1235_v26, %v833_v34 }
0x12fa   :  { %837 = vrot.lane.b32.xlu0 %v835_v35, %s1250_s19 }
0x12fb   :  { %v843_v36 = vpop.permute.xlu1 %842 }
0x12fc   :  { %845 = vst.msk [vmem:[#allocation3] sm:$0x3] %vm15_vm0, %v843_v36 }
0x1303   :  { %v851_v37 = vld [vmem:[#allocation3] sm:$0x3] }
0x1304   :  { %934 = vrot.lane.b32.xlu1 %v851_v37, %s1250_s19 }
0x136c   :  { %v838_v38 = vpop.permute.xlu0 %837 }
0x136d   :  { %840 = vst.msk [vmem:[#allocation2] sm:$0x3] %vm15_vm0, %v838_v38  ;;  %995 = vst.msk [vmem:[%s1465_s2 + $0xc] sm:$0x3] %vm15_vm0, %v838_v38 }
0x1374   :  { %v850_v39 = vld [vmem:[#allocation2] sm:$0x3] }
0x1375   :  { %1126 = vmatmul.mubr.msk.f32.vlgmr.msra.gmra.mrb[6].mxu1 %vm25_vm2, %v850_v39 }
0x1376   :  { %v935_v51 = vpop.permute.xlu1 %934 }
0x1448   :  { %v921_v41 = vpop.f32.mrb[6].mxu1 }
0x1449   :  { %v925_v42 = vadd.f32 %v996_v40, %v921_v41  ;;  %v1127_v43 = vpop.f32.mrb[7].mxu1 }
0x144b   :  { %1238 = vtanh.f32 %v925_v42  ;;  %v998_v45 = vmul.f32 -1.442695, %v925_v42 }
0x144d   :  { %1240 = vpow2.f32 %v998_v45 }
0x1455   :  { %v1239_v44 = vpop.eup %1238 }
0x1456   :  { %939 = vrot.lane.b32.xlu0 %v1239_v44, %s1249_s18 }
0x1457   :  { %v1241_v46 = vpop.eup %1240 }
0x1458   :  { %v929_v47 = vadd.f32 1.0, %v1241_v46 }
0x145a   :  { %1242 = vrcp.f32 %v929_v47 }
0x1464   :  { %v1243_v48 = vpop.eup %1242 }
0x1465   :  { %v937_v52 = vmul.f32 %v1243_v48, %v935_v51 }
0x14c8   :  { %v940_v49 = vpop.permute.xlu0 %939 }
0x14c9   :  { %v942_v50 = vmul.f32 %v1243_v48, %v940_v49 }
0x14cb   :  { %944 = vrot.lane.b32.xlu0 %v942_v50, %s1250_s19 }
0x153d   :  { %v945_v53 = vpop.permute.xlu0 %944 }
0x153e   :  { %v947_v54 = vadd.f32 %v945_v53, %v937_v52 }
0x1540   :  { %1244 = vtanh.f32 %v947_v54 }
0x154a   :  { %v1245_v55 = vpop.eup %1244 }
0x154b   :  { %950 = vrot.lane.b32.xlu1 %v1245_v55, %s1249_s18 }
0x154f   :  { %960 = vrot.lane.b32.xlu1 %v947_v54, %s1251_s20 }
0x15bd   :  { %v951_v56 = vpop.permute.xlu1 %950 }
0x15be   :  { %v953_v57 = vmul.f32 %v1243_v48, %v951_v56 }
0x15c0   :  { %955 = vrot.lane.b32.xlu0 %v953_v57, %s1250_s19 }
0x15c1   :  { %v961_v58 = vpop.permute.xlu1 %960 }
0x15c2   :  { %963 = vst.msk [vmem:[#allocation3] sm:$0x3] %vm15_vm0, %v961_v58 }
0x1632   :  { %v956_v59 = vpop.permute.xlu0 %955 }
0x1633   :  { %958 = vst.msk [vmem:[#allocation2] sm:$0x3] %vm15_vm0, %v956_v59  ;;  %999 = vst.msk [vmem:[%s1465_s2 + $0xe] sm:$0x3] %vm15_vm0, %v956_v59 }

// kernel: tlstm_forward.7
= control target key start
LH: loop header
LB: loop body
LE: loop exit
PB: predicated region body
PF: predicated region fallthrough
CT: control target
= control target key end

     0   :  { %vm21_vm0 = vcmask 254976   ;;  %v1467_v0 = vmov 0.0|0.0   ;;  %v1468_v4 = vmov 0.0   ;;  %vm1469_vm1 = vmmov 0   ;;  %s1470_s24 = smov 64   ;;  %s1471_s25 = smov 32   ;;  %s1730_s1 = inlined_call_operand.vmem [shape: f32[32,128], index: 1, kind: input, shape index: {}]   ;;  %s1731_s0 = inlined_call_operand.vmem [shape: f32[8,2,128], index: 0, kind: input, shape index: {}]   ;;  %s1732_s2 = inlined_call_operand.vmem [shape: f32[32,8], index: 2, kind: input, shape index: {}]   ;;  %s1733_s3 = inlined_call_operand.vmem [shape: f32[1,8], index: 3, kind: input, shape index: {}]   ;;  %s1734_s4 = inlined_call_operand.vmem [shape: f32[8,2,8], index: 4, kind: output, shape index: {}]  }
   0x1   :  { %1340 = vmatprep.subr.bf16.mxu0 %v1467_v0  ;;  %v24_v1 = vld [vmem:[%s1730_s1] sm:$0xff]  ;;  %v25_v2 = vld [vmem:[%s1730_s1 + $0x8] sm:$0xff]  ;;  %v26_v3 = vld [vmem:[%s1730_s1 + $0x10] sm:$0xff]  ;;  %22 = vst.msk [vmem:[#allocation2] sm:$0x3] %vm21_vm0, %v1468_v4  ;;  %1249 = vmatprep.mubr.msk.f32.mxu0 %vm1469_vm1, %v1468_v4  ;;  %vm31_vm2 = vcmask 261120  }
   0x2   :  { %23 = vst.msk [vmem:[#allocation3] sm:$0x3] %vm21_vm0, %v1468_v4  ;;  %v1515_v5 = vpack.c.bf16 %v25_v2, %v24_v1  ;;  %v27_v6 = vld [vmem:[%s1730_s1 + $0x18] sm:$0xff]  ;;  %1346 = vmatprep.subr.bf16.mxu1 %v1467_v0  ;;  %1260 = vmatprep.mubr.msk.f32.mxu1 %vm1469_vm1, %v1468_v4  ;;  %v28_v9 = vld [vmem:[%s1731_s0] sm:$0x3]  ;;  %s1472_s26 = smov 96  }
   0x3   :  { %v1524_v7 = vpack.c.bf16 %v27_v6, %v26_v3  ;;  %v1171_v32 = vld [vmem:[%s1731_s0 + $0x2] sm:$0x3]  ;;  %v1174_v54 = vld [vmem:[%s1731_s0 + $0x4] sm:$0x3]  ;;  %vm1156_vm3 = vcmask 58368  }
   0x4   :  { %1342 = vmatpush3.bf16.msra.mxu0 %v1515_v5  ;;  %1348 = vmatpush3.bf16.msra.mxu1 %v1515_v5 }
   0x5   :  { %1343 = vmatprep.subr.bf16.mxu0 %v1467_v0  ;;  %1349 = vmatprep.subr.bf16.mxu1 %v1467_v0 }
   0x8   :  { %1345 = vmatpush3.bf16.msra.mxu0 %v1524_v7  ;;  %v29_v8 = vld [vmem:[#allocation2] sm:$0x3]  ;;  %1351 = vmatpush3.bf16.msra.mxu1 %v1524_v7 }
   0x9   :  { %1352 = vmatprep.subr.bf16.mxu0 %v1467_v0  ;;  %1358 = vmatprep.subr.bf16.mxu1 %v1467_v0  ;;  %v30_v14 = vld [vmem:[#allocation3] sm:$0x3] }
   0xb   :  { %1250 = vmatmul.mubr.msk.f32.vlgmr.msra.gmra.mrb[0].mxu0 %vm31_vm2, %v29_v8 }
   0xc   :  { %1354 = vmatpush3.bf16.msra.mxu0 %v1515_v5  ;;  %1271 = vmatprep.mubr.msk.f32.mxu0 %vm1469_vm1, %v1468_v4 }
   0xd   :  { %1355 = vmatprep.subr.bf16.mxu0 %v1467_v0 }
  0x10   :  { %1357 = vmatpush3.bf16.msra.mxu0 %v1524_v7 }
  0x11   :  { %1364 = vmatprep.subr.bf16.mxu0 %v1467_v0 }
  0xde   :  { %v101_v10 = vpop.f32.mrb[0].mxu0 }
  0xdf   :  { %v105_v11 = vadd.f32 %v101_v10, %v28_v9  ;;  %v1251_v12 = vpop.f32.mrb[1].mxu0 }
  0xe1   :  { %1403 = vtanh.f32 %v105_v11  ;;  %v1170_v15 = vmul.f32 -1.442695, %v105_v11 }
  0xe3   :  { %1405 = vpow2.f32 %v1170_v15 }
  0xeb   :  { %v1404_v13 = vpop.eup %1403 }
  0xec   :  { %119 = vrot.lane.b32.xlu0 %v1404_v13, %s1470_s24 }
  0xed   :  { %v1406_v16 = vpop.eup %1405 }
  0xee   :  { %v109_v17 = vadd.f32 1.0, %v1406_v16  ;;  %v1177_v16 = vld [vmem:[%s1731_s0 + $0x6] sm:$0x3] }
  0xf0   :  { %114 = vrot.lane.b32.xlu0 %v30_v14, %s1471_s25  ;;  %1407 = vrcp.f32 %v109_v17 }
  0xfa   :  { %v1408_v18 = vpop.eup %1407 }
 0x15e   :  { %v120_v19 = vpop.permute.xlu0 %119 }
 0x15f   :  { %v122_v20 = vmul.f32 %v1408_v18, %v120_v19 }
 0x161   :  { %124 = vrot.lane.b32.xlu1 %v122_v20, %s1471_s25 }
 0x162   :  { %v115_v21 = vpop.permute.xlu0 %114 }
 0x163   :  { %v117_v22 = vmul.f32 %v1408_v18, %v115_v21 }
 0x1d3   :  { %v125_v23 = vpop.permute.xlu1 %124 }
 0x1d4   :  { %v127_v24 = vadd.f32 %v125_v23, %v117_v22 }
 0x1d6   :  { %1409 = vtanh.f32 %v127_v24 }
 0x1e0   :  { %v1410_v25 = vpop.eup %1409 }
 0x1e1   :  { %130 = vrot.lane.b32.xlu1 %v1410_v25, %s1470_s24 }
 0x1e5   :  { %141 = vrot.lane.b32.xlu1 %v127_v24, %s1472_s26 }
 0x253   :  { %v131_v26 = vpop.permute.xlu1 %130 }
 0x254   :  { %v133_v27 = vmul.f32 %v1408_v18, %v131_v26 }
 0x256   :  { %135 = vrot.lane.b32.xlu0 %v133_v27, %s1471_s25 }
 0x257   :  { %v142_v28 = vpop.permute.xlu1 %141 }
 0x258   :  { %144 = vst.msk [vmem:[#allocation3] sm:$0x3] %vm21_vm0, %v142_v28 }
 0x25f   :  { %v149_v29 = vld [vmem:[#allocation3] sm:$0x3] }
 0x260   :  { %232 = vrot.lane.b32.xlu1 %v149_v29, %s1471_s25 }
 0x2c8   :  { %v136_v30 = vpop.permute.xlu0 %135 }
 0x2c9   :  { %139 = vst.msk [vmem:[#allocation2] sm:$0x3] %vm21_vm0, %v136_v30  ;;  %145 = vst.msk [vmem:[#allocation4] sm:$0x3] %vm21_vm0, %v136_v30 }
 0x2d0   :  { %v148_v31 = vld [vmem:[#allocation2] sm:$0x3] }
 0x2d1   :  { %1261 = vmatmul.mubr.msk.f32.vlgmr.msra.gmra.mrb[0].mxu1 %vm31_vm2, %v148_v31 }
 0x2d2   :  { %1360 = vmatpush3.bf16.msra.mxu1 %v1515_v5  ;;  %1282 = vmatprep.mubr.msk.f32.mxu1 %vm1469_vm1, %v1468_v4  ;;  %v233_v43 = vpop.permute.xlu1 %232 }
 0x2d3   :  { %1361 = vmatprep.subr.bf16.mxu1 %v1467_v0 }
 0x2d6   :  { %1363 = vmatpush3.bf16.msra.mxu1 %v1524_v7 }
 0x2d7   :  { %1370 = vmatprep.subr.bf16.mxu1 %v1467_v0 }
 0x3a4   :  { %v219_v33 = vpop.f32.mrb[0].mxu1 }
 0x3a5   :  { %v223_v34 = vadd.f32 %v1171_v32, %v219_v33  ;;  %v1262_v35 = vpop.f32.mrb[1].mxu1 }
 0x3a7   :  { %1411 = vtanh.f32 %v223_v34  ;;  %v1173_v37 = vmul.f32 -1.442695, %v223_v34 }
 0x3a9   :  { %1413 = vpow2.f32 %v1173_v37 }
 0x3b1   :  { %v1412_v36 = vpop.eup %1411 }
 0x3b2   :  { %237 = vrot.lane.b32.xlu0 %v1412_v36, %s1470_s24 }
 0x3b3   :  { %v1414_v38 = vpop.eup %1413 }
 0x3b4   :  { %v227_v39 = vadd.f32 1.0, %v1414_v38  ;;  %v1180_v38 = vld [vmem:[%s1731_s0 + $0x8] sm:$0x3] }
 0x3b6   :  { %1415 = vrcp.f32 %v227_v39 }
 0x3c0   :  { %v1416_v40 = vpop.eup %1415 }
 0x3c1   :  { %v235_v44 = vmul.f32 %v1416_v40, %v233_v43 }
 0x424   :  { %v238_v41 = vpop.permute.xlu0 %237 }
 0x425   :  { %v240_v42 = vmul.f32 %v1416_v40, %v238_v41 }
 0x427   :  { %242 = vrot.lane.b32.xlu0 %v240_v42, %s1471_s25 }
 0x499   :  { %v243_v45 = vpop.permute.xlu0 %242 }
 0x49a   :  { %v245_v46 = vadd.f32 %v243_v45, %v235_v44 }
 0x49c   :  { %1417 = vtanh.f32 %v245_v46 }
 0x4a6   :  { %v1418_v47 = vpop.eup %1417 }
 0x4a7   :  { %248 = vrot.lane.b32.xlu1 %v1418_v47, %s1470_s24 }
 0x4ab   :  { %258 = vrot.lane.b32.xlu1 %v245_v46, %s1472_s26 }
 0x519   :  { %v249_v48 = vpop.permute.xlu1 %248 }
 0x51a   :  { %v251_v49 = vmul.f32 %v1416_v40, %v249_v48 }
 0x51c   :  { %253 = vrot.lane.b32.xlu0 %v251_v49, %s1471_s25 }
 0x51d   :  { %v259_v50 = vpop.permute.xlu1 %258 }
 0x51e   :  { %261 = vst.msk [vmem:[#allocation3] sm:$0x3] %vm21_vm0, %v259_v50 }
 0x525   :  { %v267_v51 = vld [vmem:[#allocation3] sm:$0x3] }
 0x526   :  { %350 = vrot.lane.b32.xlu1 %v267_v51, %s1471_s25 }
 0x58e   :  { %v254_v52 = vpop.permute.xlu0 %253 }
 0x58f   :  { %256 = vst.msk [vmem:[#allocation2] sm:$0x3] %vm21_vm0, %v254_v52  ;;  %263 = vst.msk [vmem:[#allocation4 + $0x2] sm:$0x3] %vm21_vm0, %v254_v52 }
 0x596   :  { %v266_v53 = vld [vmem:[#allocation2] sm:$0x3] }
 0x597   :  { %1272 = vmatmul.mubr.msk.f32.vlgmr.msra.gmra.mrb[2].mxu0 %vm31_vm2, %v266_v53 }
 0x598   :  { %1366 = vmatpush3.bf16.msra.mxu0 %v1515_v5  ;;  %1293 = vmatprep.mubr.msk.f32.mxu0 %vm1469_vm1, %v1468_v4  ;;  %v351_v2 = vpop.permute.xlu1 %350 }
 0x599   :  { %1367 = vmatprep.subr.bf16.mxu0 %v1467_v0 }
 0x59c   :  { %1369 = vmatpush3.bf16.msra.mxu0 %v1524_v7 }
 0x59d   :  { %1376 = vmatprep.subr.bf16.mxu0 %v1467_v0 }
 0x66a   :  { %v337_v55 = vpop.f32.mrb[2].mxu0 }
 0x66b   :  { %v341_v56 = vadd.f32 %v1174_v54, %v337_v55  ;;  %v1273_v57 = vpop.f32.mrb[3].mxu0 }
 0x66d   :  { %1419 = vtanh.f32 %v341_v56  ;;  %v1176_v59 = vmul.f32 -1.442695, %v341_v56 }
 0x66f   :  { %1421 = vpow2.f32 %v1176_v59 }
 0x677   :  { %v1420_v58 = vpop.eup %1419 }
 0x678   :  { %355 = vrot.lane.b32.xlu0 %v1420_v58, %s1470_s24 }
 0x679   :  { %v1422_v60 = vpop.eup %1421 }
 0x67a   :  { %v345_v61 = vadd.f32 1.0, %v1422_v60  ;;  %v1183_v60 = vld [vmem:[%s1731_s0 + $0xa] sm:$0x3] }
 0x67c   :  { %1423 = vrcp.f32 %v345_v61 }
 0x686   :  { %v1424_v62 = vpop.eup %1423 }
 0x687   :  { %v353_v3 = vmul.f32 %v1424_v62, %v351_v2 }
 0x6ea   :  { %v356_v63 = vpop.permute.xlu0 %355 }
 0x6eb   :  { %v358_v1 = vmul.f32 %v1424_v62, %v356_v63 }
 0x6ed   :  { %360 = vrot.lane.b32.xlu0 %v358_v1, %s1471_s25 }
 0x75f   :  { %v361_v6 = vpop.permute.xlu0 %360 }
 0x760   :  { %v363_v8 = vadd.f32 %v361_v6, %v353_v3 }
 0x762   :  { %1425 = vtanh.f32 %v363_v8 }
 0x76c   :  { %v1426_v9 = vpop.eup %1425 }
 0x76d   :  { %366 = vrot.lane.b32.xlu1 %v1426_v9, %s1470_s24 }
 0x771   :  { %376 = vrot.lane.b32.xlu1 %v363_v8, %s1472_s26 }
 0x7df   :  { %v367_v10 = vpop.permute.xlu1 %366 }
 0x7e0   :  { %v369_v11 = vmul.f32 %v1424_v62, %v367_v10 }
 0x7e2   :  { %371 = vrot.lane.b32.xlu0 %v369_v11, %s1471_s25 }
 0x7e3   :  { %v377_v12 = vpop.permute.xlu1 %376 }
 0x7e4   :  { %379 = vst.msk [vmem:[#allocation3] sm:$0x3] %vm21_vm0, %v377_v12 }
 0x7eb   :  { %v385_v13 = vld [vmem:[#allocation3] sm:$0x3] }
 0x7ec   :  { %468 = vrot.lane.b32.xlu1 %v385_v13, %s1471_s25 }
 0x854   :  { %v372_v14 = vpop.permute.xlu0 %371 }
 0x855   :  { %374 = vst.msk [vmem:[#allocation2] sm:$0x3] %vm21_vm0, %v372_v14  ;;  %381 = vst.msk [vmem:[#allocation4 + $0x4] sm:$0x3] %vm21_vm0, %v372_v14 }
 0x85c   :  { %v384_v15 = vld [vmem:[#allocation2] sm:$0x3] }
 0x85d   :  { %1283 = vmatmul.mubr.msk.f32.vlgmr.msra.gmra.mrb[2].mxu1 %vm31_vm2, %v384_v15 }
 0x85e   :  { %1372 = vmatpush3.bf16.msra.mxu1 %v1515_v5  ;;  %1304 = vmatprep.mubr.msk.f32.mxu1 %vm1469_vm1, %v1468_v4  ;;  %v469_v27 = vpop.permute.xlu1 %468 }
 0x85f   :  { %1373 = vmatprep.subr.bf16.mxu1 %v1467_v0 }
 0x862   :  { %1375 = vmatpush3.bf16.msra.mxu1 %v1524_v7 }
 0x863   :  { %1382 = vmatprep.subr.bf16.mxu1 %v1467_v0 }
 0x930   :  { %v455_v17 = vpop.f32.mrb[2].mxu1 }
 0x931   :  { %v459_v18 = vadd.f32 %v1177_v16, %v455_v17  ;;  %v1284_v19 = vpop.f32.mrb[3].mxu1  ;;  %v1473_v16 = vmov 1983009808  }
 0x932   :  { %v1002_v17 = vunpack.c.l.s4 %v1473_v16 }
 0x933   :  { %1427 = vtanh.f32 %v459_v18  ;;  %v1179_v21 = vmul.f32 -1.442695, %v459_v18  ;;  %v1004_v18 = vlaneseq }
 0x935   :  { %1429 = vpow2.f32 %v1179_v21  ;;  %v1005_v21 = vshrl.u32 %v1004_v18, 7 }
 0x93d   :  { %v1428_v20 = vpop.eup %1427 }
 0x93e   :  { %473 = vrot.lane.b32.xlu0 %v1428_v20, %s1470_s24  ;;  %v1003_v20 = vunpack.c.0.s8 %v1002_v17 }
 0x93f   :  { %v1430_v22 = vpop.eup %1429 }
 0x940   :  { %v463_v23 = vadd.f32 1.0, %v1430_v22  ;;  %v973_v22 = vld [vmem:[#allocation4 + $0x2] sm:$0x3] }
 0x942   :  { %1431 = vrcp.f32 %v463_v23  ;;  %v974_v23 = vld [vmem:[#allocation4 + $0x4] sm:$0x3] }
 0x94c   :  { %v1432_v24 = vpop.eup %1431 }
 0x94d   :  { %v471_v28 = vmul.f32 %v1432_v24, %v469_v27 }
 0x9b0   :  { %v474_v25 = vpop.permute.xlu0 %473 }
 0x9b1   :  { %v476_v26 = vmul.f32 %v1432_v24, %v474_v25 }
 0x9b3   :  { %478 = vrot.lane.b32.xlu0 %v476_v26, %s1471_s25  ;;  %v972_v26 = vld [vmem:[#allocation4] sm:$0x3] }
 0x9b4   :  { %v999_v27 = vcombine.low %v972_v26, %v973_v22  ;;  %v1192_v26 = vld [vmem:[%s1733_s3] ss:$0 sm:$0xff] }
 0xa25   :  { %v479_v29 = vpop.permute.xlu0 %478 }
 0xa26   :  { %v481_v30 = vadd.f32 %v479_v29, %v471_v28  ;;  %v1646_v28 = vsub.s32 %v1003_v20, %v1005_v21 }
 0xa28   :  { %1433 = vtanh.f32 %v481_v30 }
 0xa32   :  { %v1434_v31 = vpop.eup %1433 }
 0xa33   :  { %484 = vrot.lane.b32.xlu1 %v1434_v31, %s1470_s24 }
 0xa37   :  { %494 = vrot.lane.b32.xlu1 %v481_v30, %s1472_s26  ;;  %v1007_v30 = vrot.slane %v999_v27, %v1646_v28 }
 0xaa5   :  { %v485_v32 = vpop.permute.xlu1 %484 }
 0xaa6   :  { %v487_v33 = vmul.f32 %v1432_v24, %v485_v32 }
 0xaa8   :  { %489 = vrot.lane.b32.xlu0 %v487_v33, %s1471_s25  ;;  %v1186_v33 = vld [vmem:[%s1731_s0 + $0xc] sm:$0x3] }
 0xaa9   :  { %v495_v34 = vpop.permute.xlu1 %494 }
 0xaaa   :  { %497 = vst.msk [vmem:[#allocation3] sm:$0x3] %vm21_vm0, %v495_v34 }
 0xab1   :  { %v503_v35 = vld [vmem:[#allocation3] sm:$0x3] }
 0xab2   :  { %586 = vrot.lane.b32.xlu1 %v503_v35, %s1471_s25 }
 0xb1a   :  { %v490_v36 = vpop.permute.xlu0 %489 }
 0xb1b   :  { %492 = vst.msk [vmem:[#allocation2] sm:$0x3] %vm21_vm0, %v490_v36  ;;  %499 = vst.msk [vmem:[#allocation4 + $0x6] sm:$0x3] %vm21_vm0, %v490_v36 }
 0xb22   :  { %v502_v37 = vld [vmem:[#allocation2] sm:$0x3]  ;;  %v975_v19 = vld [vmem:[#allocation4 + $0x6] sm:$0x3] }
 0xb23   :  { %1294 = vmatmul.mubr.msk.f32.vlgmr.msra.gmra.mrb[4].mxu0 %vm31_vm2, %v502_v37  ;;  %v1000_v25 = vcombine.low %v974_v23, %v975_v19 }
 0xb24   :  { %1378 = vmatpush3.bf16.msra.mxu0 %v1515_v5  ;;  %1315 = vmatprep.mubr.msk.f32.mxu0 %vm1469_vm1, %v1468_v4  ;;  %v587_v49 = vpop.permute.xlu1 %586 }
 0xb25   :  { %1379 = vmatprep.subr.bf16.mxu0 %v1467_v0  ;;  %v1014_v29 = vrot.slane %v1000_v25, %v1646_v28 }
 0xb27   :  { %v1015_v32 = vcombine.low %v1007_v30, %v1014_v29 }
 0xb28   :  { %1381 = vmatpush3.bf16.msra.mxu0 %v1524_v7 }
 0xbf6   :  { %v573_v39 = vpop.f32.mrb[4].mxu0 }
 0xbf7   :  { %v577_v40 = vadd.f32 %v1180_v38, %v573_v39  ;;  %v1295_v41 = vpop.f32.mrb[5].mxu0 }
 0xbf9   :  { %1435 = vtanh.f32 %v577_v40  ;;  %v1182_v43 = vmul.f32 -1.442695, %v577_v40 }
 0xbfb   :  { %1437 = vpow2.f32 %v1182_v43 }
 0xc03   :  { %v1436_v42 = vpop.eup %1435 }
 0xc04   :  { %591 = vrot.lane.b32.xlu0 %v1436_v42, %s1470_s24 }
 0xc05   :  { %v1438_v44 = vpop.eup %1437 }
 0xc06   :  { %v581_v45 = vadd.f32 1.0, %v1438_v44 }
 0xc08   :  { %1439 = vrcp.f32 %v581_v45 }
 0xc12   :  { %v1440_v46 = vpop.eup %1439 }
 0xc13   :  { %v589_v50 = vmul.f32 %v1440_v46, %v587_v49 }
 0xc76   :  { %v592_v47 = vpop.permute.xlu0 %591 }
 0xc77   :  { %v594_v48 = vmul.f32 %v1440_v46, %v592_v47 }
 0xc79   :  { %596 = vrot.lane.b32.xlu0 %v594_v48, %s1471_s25 }
 0xceb   :  { %v597_v51 = vpop.permute.xlu0 %596 }
 0xcec   :  { %v599_v52 = vadd.f32 %v597_v51, %v589_v50 }
 0xcee   :  { %1441 = vtanh.f32 %v599_v52 }
 0xcf8   :  { %v1442_v53 = vpop.eup %1441 }
 0xcf9   :  { %602 = vrot.lane.b32.xlu1 %v1442_v53, %s1470_s24 }
 0xcfd   :  { %612 = vrot.lane.b32.xlu1 %v599_v52, %s1472_s26 }
 0xd6b   :  { %v603_v54 = vpop.permute.xlu1 %602 }
 0xd6c   :  { %v605_v55 = vmul.f32 %v1440_v46, %v603_v54 }
 0xd6e   :  { %607 = vrot.lane.b32.xlu0 %v605_v55, %s1471_s25  ;;  %v1189_v55 = vld [vmem:[%s1731_s0 + $0xe] sm:$0x3] }
 0xd6f   :  { %v613_v56 = vpop.permute.xlu1 %612 }
 0xd70   :  { %615 = vst.msk [vmem:[#allocation3] sm:$0x3] %vm21_vm0, %v613_v56 }
 0xd77   :  { %v621_v57 = vld [vmem:[#allocation3] sm:$0x3] }
 0xd78   :  { %704 = vrot.lane.b32.xlu1 %v621_v57, %s1471_s25 }
 0xde0   :  { %v608_v58 = vpop.permute.xlu0 %607 }
 0xde1   :  { %610 = vst.msk [vmem:[#allocation2] sm:$0x3] %vm21_vm0, %v608_v58  ;;  %617 = vst.msk [vmem:[#allocation4 + $0x8] sm:$0x3] %vm21_vm0, %v608_v58 }
 0xde8   :  { %v620_v59 = vld [vmem:[#allocation2] sm:$0x3]  ;;  %v976_v18 = vld [vmem:[#allocation4 + $0x8] sm:$0x3] }
 0xde9   :  { %1305 = vmatmul.mubr.msk.f32.vlgmr.msra.gmra.mrb[4].mxu1 %vm31_vm2, %v620_v59 }
 0xdea   :  { %1384 = vmatpush3.bf16.msra.mxu1 %v1515_v5  ;;  %1326 = vmatprep.mubr.msk.f32.mxu1 %vm1469_vm1, %v1468_v4 }
 0xdeb   :  { %1385 = vmatprep.subr.bf16.mxu1 %v1467_v0 }
 0xdee   :  { %1387 = vmatpush3.bf16.msra.mxu1 %v1524_v7  ;;  %v705_v7 = vpop.permute.xlu1 %704 }
 0xebc   :  { %v691_v61 = vpop.f32.mrb[4].mxu1 }
 0xebd   :  { %v695_v62 = vadd.f32 %v1183_v60, %v691_v61  ;;  %v1306_v63 = vpop.f32.mrb[5].mxu1 }
 0xebf   :  { %1443 = vtanh.f32 %v695_v62  ;;  %v1185_v2 = vmul.f32 -1.442695, %v695_v62 }
 0xec1   :  { %1445 = vpow2.f32 %v1185_v2 }
 0xec9   :  { %v1444_v1 = vpop.eup %1443 }
 0xeca   :  { %709 = vrot.lane.b32.xlu0 %v1444_v1, %s1470_s24 }
 0xecb   :  { %v1446_v5 = vpop.eup %1445 }
 0xecc   :  { %v699_v3 = vadd.f32 1.0, %v1446_v5 }
 0xece   :  { %1447 = vrcp.f32 %v699_v3 }
 0xed8   :  { %v1448_v4 = vpop.eup %1447 }
 0xed9   :  { %v707_v8 = vmul.f32 %v1448_v4, %v705_v7  ;;  %v980_v7 = vld [vmem:[%s1732_s2] sm:$0xff] }
 0xf3c   :  { %v710_v0 = vpop.permute.xlu0 %709 }
 0xf3d   :  { %v712_v6 = vmul.f32 %v1448_v4, %v710_v0 }
 0xf3f   :  { %714 = vrot.lane.b32.xlu0 %v712_v6, %s1471_s25 }
 0xfb1   :  { %v715_v9 = vpop.permute.xlu0 %714 }
 0xfb2   :  { %v717_v10 = vadd.f32 %v715_v9, %v707_v8  ;;  %v981_v8 = vld [vmem:[%s1732_s2 + $0x8] sm:$0xff]  ;;  %v982_v9 = vld [vmem:[%s1732_s2 + $0x10] sm:$0xff] }
 0xfb4   :  { %1449 = vtanh.f32 %v717_v10 }
 0xfbe   :  { %v1450_v11 = vpop.eup %1449 }
 0xfbf   :  { %720 = vrot.lane.b32.xlu1 %v1450_v11, %s1470_s24  ;;  %v983_v11 = vld [vmem:[%s1732_s2 + $0x18] sm:$0xff] }
 0xfc3   :  { %730 = vrot.lane.b32.xlu1 %v717_v10, %s1472_s26  ;;  %v1388_v10 = vpack.c.bf16 %v981_v8, %v980_v7 }
 0xfc5   :  { %1389 = vmatprep.subr.bf16.mxu0 %v1388_v10 }
0x1031   :  { %v721_v12 = vpop.permute.xlu1 %720 }
0x1032   :  { %v723_v13 = vmul.f32 %v1448_v4, %v721_v12  ;;  %v1392_v12 = vpack.c.bf16 %v983_v11, %v982_v9 }
0x1034   :  { %725 = vrot.lane.b32.xlu0 %v723_v13, %s1471_s25 }
0x1035   :  { %v731_v14 = vpop.permute.xlu1 %730 }
0x1036   :  { %733 = vst.msk [vmem:[#allocation3] sm:$0x3] %vm21_vm0, %v731_v14 }
0x103d   :  { %v739_v15 = vld [vmem:[#allocation3] sm:$0x3] }
0x103e   :  { %822 = vrot.lane.b32.xlu1 %v739_v15, %s1471_s25 }
0x10a6   :  { %v726_v24 = vpop.permute.xlu0 %725 }
0x10a7   :  { %728 = vst.msk [vmem:[#allocation2] sm:$0x3] %vm21_vm0, %v726_v24  ;;  %735 = vst.msk [vmem:[#allocation4 + $0xa] sm:$0x3] %vm21_vm0, %v726_v24 }
0x10ae   :  { %v738_v31 = vld [vmem:[#allocation2] sm:$0x3]  ;;  %v977_v17 = vld [vmem:[#allocation4 + $0xa] sm:$0x3] }
0x10af   :  { %1316 = vmatmul.mubr.msk.f32.vlgmr.msra.gmra.mrb[6].mxu0 %vm31_vm2, %v738_v31  ;;  %v1016_v19 = vcombine.low %v976_v18, %v977_v17 }
0x10b0   :  { %1337 = vmatprep.mubr.msk.f32.mxu0 %vm31_vm2, %v1015_v32  ;;  %v823_v44 = vpop.permute.xlu1 %822  ;;  %1391 = vmatpush3.bf16.msra.mxu0 %v1388_v10 }
0x10b1   :  { %1393 = vmatprep.subr.bf16.mxu0 %v1392_v12  ;;  %v1024_v23 = vrot.slane %v1016_v19, %v1646_v28 }
0x10b4   :  { %1395 = vmatpush3.bf16.msra.mxu0 %v1392_v12 }
0x1182   :  { %v809_v34 = vpop.f32.mrb[6].mxu0 }
0x1183   :  { %v813_v35 = vadd.f32 %v1186_v33, %v809_v34  ;;  %v1317_v36 = vpop.f32.mrb[7].mxu0 }
0x1185   :  { %1451 = vtanh.f32 %v813_v35  ;;  %v1188_v38 = vmul.f32 -1.442695, %v813_v35 }
0x1187   :  { %1453 = vpow2.f32 %v1188_v38 }
0x118f   :  { %v1452_v37 = vpop.eup %1451 }
0x1190   :  { %827 = vrot.lane.b32.xlu0 %v1452_v37, %s1470_s24 }
0x1191   :  { %v1454_v39 = vpop.eup %1453 }
0x1192   :  { %v817_v40 = vadd.f32 1.0, %v1454_v39 }
0x1194   :  { %1455 = vrcp.f32 %v817_v40 }
0x119e   :  { %v1456_v41 = vpop.eup %1455 }
0x119f   :  { %v825_v45 = vmul.f32 %v1456_v41, %v823_v44 }
0x1202   :  { %v828_v42 = vpop.permute.xlu0 %827 }
0x1203   :  { %v830_v43 = vmul.f32 %v1456_v41, %v828_v42 }
0x1205   :  { %832 = vrot.lane.b32.xlu0 %v830_v43, %s1471_s25 }
0x1277   :  { %v833_v46 = vpop.permute.xlu0 %832 }
0x1278   :  { %v835_v47 = vadd.f32 %v833_v46, %v825_v45 }
0x127a   :  { %1457 = vtanh.f32 %v835_v47 }
0x1284   :  { %v1458_v48 = vpop.eup %1457 }
0x1285   :  { %838 = vrot.lane.b32.xlu1 %v1458_v48, %s1470_s24 }
0x1289   :  { %848 = vrot.lane.b32.xlu1 %v835_v47, %s1472_s26 }
0x12f7   :  { %v839_v49 = vpop.permute.xlu1 %838 }
0x12f8   :  { %v841_v50 = vmul.f32 %v1456_v41, %v839_v49 }
0x12fa   :  { %843 = vrot.lane.b32.xlu0 %v841_v50, %s1471_s25 }
0x12fb   :  { %v849_v51 = vpop.permute.xlu1 %848 }
0x12fc   :  { %851 = vst.msk [vmem:[#allocation3] sm:$0x3] %vm21_vm0, %v849_v51 }
0x1303   :  { %v857_v52 = vld [vmem:[#allocation3] sm:$0x3] }
0x1304   :  { %940 = vrot.lane.b32.xlu1 %v857_v52, %s1471_s25 }
0x136c   :  { %v844_v53 = vpop.permute.xlu0 %843 }
0x136d   :  { %846 = vst.msk [vmem:[#allocation2] sm:$0x3] %vm21_vm0, %v844_v53  ;;  %853 = vst.msk [vmem:[#allocation4 + $0xc] sm:$0x3] %vm21_vm0, %v844_v53 }
0x1374   :  { %v856_v54 = vld [vmem:[#allocation2] sm:$0x3]  ;;  %v978_v20 = vld [vmem:[#allocation4 + $0xc] sm:$0x3] }
0x1375   :  { %1327 = vmatmul.mubr.msk.f32.vlgmr.msra.gmra.mrb[6].mxu1 %vm31_vm2, %v856_v54 }
0x1376   :  { %v941_v5 = vpop.permute.xlu1 %940 }
0x1448   :  { %v927_v56 = vpop.f32.mrb[6].mxu1 }
0x1449   :  { %v931_v57 = vadd.f32 %v1189_v55, %v927_v56  ;;  %v1328_v58 = vpop.f32.mrb[7].mxu1 }
0x144b   :  { %1459 = vtanh.f32 %v931_v57  ;;  %v1191_v60 = vmul.f32 -1.442695, %v931_v57 }
0x144d   :  { %1461 = vpow2.f32 %v1191_v60 }
0x1455   :  { %v1460_v59 = vpop.eup %1459 }
0x1456   :  { %945 = vrot.lane.b32.xlu0 %v1460_v59, %s1470_s24 }
0x1457   :  { %v1462_v61 = vpop.eup %1461 }
0x1458   :  { %v935_v62 = vadd.f32 1.0, %v1462_v61 }
0x145a   :  { %1463 = vrcp.f32 %v935_v62 }
0x1464   :  { %v1464_v63 = vpop.eup %1463 }
0x1465   :  { %v943_v3 = vmul.f32 %v1464_v63, %v941_v5 }
0x14c8   :  { %v946_v1 = vpop.permute.xlu0 %945 }
0x14c9   :  { %v948_v2 = vmul.f32 %v1464_v63, %v946_v1 }
0x14cb   :  { %950 = vrot.lane.b32.xlu0 %v948_v2, %s1471_s25 }
0x153d   :  { %v951_v4 = vpop.permute.xlu0 %950 }
0x153e   :  { %v953_v0 = vadd.f32 %v951_v4, %v943_v3 }
0x1540   :  { %1465 = vtanh.f32 %v953_v0 }
0x154a   :  { %v1466_v6 = vpop.eup %1465 }
0x154b   :  { %956 = vrot.lane.b32.xlu1 %v1466_v6, %s1470_s24 }
0x154f   :  { %966 = vrot.lane.b32.xlu1 %v953_v0, %s1472_s26 }
0x15bd   :  { %v957_v13 = vpop.permute.xlu1 %956 }
0x15be   :  { %v959_v14 = vmul.f32 %v1464_v63, %v957_v13 }
0x15c0   :  { %961 = vrot.lane.b32.xlu0 %v959_v14, %s1471_s25 }
0x15c1   :  { %v967_v15 = vpop.permute.xlu1 %966 }
0x15c2   :  { %969 = vst.msk [vmem:[#allocation3] sm:$0x3] %vm21_vm0, %v967_v15 }
0x1632   :  { %v962_v16 = vpop.permute.xlu0 %961 }
0x1633   :  { %964 = vst.msk [vmem:[#allocation2] sm:$0x3] %vm21_vm0, %v962_v16  ;;  %971 = vst.msk [vmem:[#allocation4 + $0xe] sm:$0x3] %vm21_vm0, %v962_v16 }
0x163a   :  { %v979_v21 = vld [vmem:[#allocation4 + $0xe] sm:$0x3] }
0x163b   :  { %v1017_v22 = vcombine.low %v978_v20, %v979_v21 }
0x163d   :  { %v1031_v24 = vrot.slane %v1017_v22, %v1646_v28 }
0x163f   :  { %v1032_v25 = vcombine.low %v1024_v23, %v1031_v24 }
0x1641   :  { %1338 = vmatmul.mubr.msk.f32.vlgmr.msra.gmra.mrb[8].mxu0 %vm31_vm2, %v1032_v25 }
0x1714   :  { %v1339_v27 = vpop.f32.mrb[8].mxu0 }
0x1715   :  { %v1109_v29 = vadd.f32 %v1339_v27, %v1192_v26  ;;  %v1103_v30 = vpop.f32.mrb[9].mxu0 }
0x1716   :  { %v1104_v31 = vadd.f32 %v1192_v26, %v1103_v30 }
0x1717   :  { %v1131_v32 = vcombine.high %v1109_v29, %v1109_v29  ;;  %v1138_v33 = vrot.slane %v1109_v29, %v1646_v28 }
0x1718   :  { %v1114_v34 = vcombine.high %v1104_v31, %v1104_v31  ;;  %v1121_v35 = vrot.slane %v1104_v31, %v1646_v28 }
0x1719   :  { %v1145_v36 = vrot.slane %v1131_v32, %v1646_v28  ;;  %v1146_v37 = vcombine.high %v1138_v33, %v1138_v33  ;;  %1161 = vst.msk [vmem:[%s1734_s4 + $0x8] sm:$0x3] %vm1156_vm3, %v1138_v33 }
0x171a   :  { %v1128_v38 = vrot.slane %v1114_v34, %v1646_v28  ;;  %v1129_v39 = vcombine.high %v1121_v35, %v1121_v35  ;;  %1157 = vst.msk [vmem:[%s1734_s4] sm:$0x3] %vm1156_vm3, %v1121_v35 }
0x171b   :  { %v1147_v40 = vcombine.high %v1145_v36, %v1145_v36  ;;  %1162 = vst.msk [vmem:[%s1734_s4 + $0xa] sm:$0x3] %vm1156_vm3, %v1146_v37  ;;  %1163 = vst.msk [vmem:[%s1734_s4 + $0xc] sm:$0x3] %vm1156_vm3, %v1145_v36 }
0x171c   :  { %v1130_v41 = vcombine.high %v1128_v38, %v1128_v38  ;;  %1158 = vst.msk [vmem:[%s1734_s4 + $0x2] sm:$0x3] %vm1156_vm3, %v1129_v39  ;;  %1159 = vst.msk [vmem:[%s1734_s4 + $0x4] sm:$0x3] %vm1156_vm3, %v1128_v38 }
0x171d   :  { %1164 = vst.msk [vmem:[%s1734_s4 + $0xe] sm:$0x3] %vm1156_vm3, %v1147_v40 }
0x171e   :  { %1160 = vst.msk [vmem:[%s1734_s4 + $0x6] sm:$0x3] %vm1156_vm3, %v1130_v41 }

</bundles_post_ra>
